<compile_context>
chip_gen: v5e
topology: v5e:2x2
jax: 0.10.0
libtpu: 0.0.40
codegen_flags: <defaults>
</compile_context>

<pallas_src>
import functools

import jax
import jax.numpy as jnp
from jax.experimental import pallas as pl
from jax.experimental.pallas import tpu as pltpu

INPUT_SIZE = 5
HIDDEN1 = 256
HIDDEN2 = 64
HIDDEN3 = 36
NUM_CLASSES = 2


def mlp_kernel(x_ref, w1_ref, b1_ref, w2_ref, b2_ref, w3_ref, b3_ref,
               w4_ref, b4_ref, o_ref):
    wdt = w1_ref.dtype
    # fc1 + relu (f32 accumulate, bias-add/ReLU in f32)
    h = jnp.dot(x_ref[...], w1_ref[...], preferred_element_type=jnp.float32)
    h = jnp.maximum(h + b1_ref[...], 0.0)
    # fc2 + relu  (cast activations back to weight dtype so bf16 path stays
    # bf16 on both MXU operands; no-op for the f32 path)
    h = jnp.dot(h.astype(wdt), w2_ref[...], preferred_element_type=jnp.float32)
    h = jnp.maximum(h + b2_ref[...], 0.0)
    # fc3 + relu
    h = jnp.dot(h.astype(wdt), w3_ref[...], preferred_element_type=jnp.float32)
    h = jnp.maximum(h + b3_ref[...], 0.0)
    # fc4 (no activation); output block is (tb, NUM_CLASSES)
    out = jnp.dot(h.astype(wdt), w4_ref[...], preferred_element_type=jnp.float32)
    o_ref[...] = (out + b4_ref[...]).astype(o_ref.dtype)


def _pick_tb(B):
    """Batch tile: large enough to amortize ~0.35us per-grid-step overhead,
    but keep >= 4 grid steps at large B so the pipeline stays full and both
    v7x TensorCores get work (irrelevant but harmless on v5e/v6e)."""
    if B <= 2048:
        return 256
    tb = 2048
    while tb > 256 and pl.cdiv(B, tb) < 4:
        tb //= 2
    return tb


@functools.partial(jax.jit, static_argnames=("tb",))
def neural_net_forward(x, params, *, tb=None):
    """x: (B, INPUT_SIZE).  params: output of prepare_params() / init_params().

    Weights stay VMEM-resident across grid steps (constant index_maps); only
    the x batch tile and the (tb, 2) output tile stream per step.
    """
    B = x.shape[0]
    if tb is None:
        tb = _pick_tb(B)

    w1, b1, w2, b2, w3, b3, w4, b4 = (
        params["w1"], params["b1"], params["w2"], params["b2"],
        params["w3"], params["b3"], params["w4"], params["b4"],
    )
    # Match x to the (possibly bf16) weight dtype; accumulation stays f32.
    x = x.astype(w1.dtype)

    B_pad = pl.cdiv(B, tb) * tb
    if B_pad != B:
        # Pad batch with zero rows; they compute garbage that is sliced away.
        x = jnp.pad(x, ((0, B_pad - B), (0, 0)))

    full = lambda arr: pl.BlockSpec(arr.shape, lambda i: (0, 0))

    out = pl.pallas_call(
        mlp_kernel,
        out_shape=jax.ShapeDtypeStruct((B_pad, NUM_CLASSES), jnp.float32),
        grid_spec=pltpu.PrefetchScalarGridSpec(
            num_scalar_prefetch=0,
            grid=(B_pad // tb,),
            in_specs=[
                pl.BlockSpec((tb, INPUT_SIZE), lambda i: (i, 0)),  # x batch tile
                full(w1), full(b1),
                full(w2), full(b2),
                full(w3), full(b3),
                full(w4), full(b4),
            ],
            # Last block dim == full array dim (2), so the (8,128) rule holds;
            # writing only 8 B/row beats the old 128-wide padded writeback.
            out_specs=pl.BlockSpec((tb, NUM_CLASSES), lambda i: (i, 0)),
        ),
        compiler_params=pltpu.CompilerParams(
            dimension_semantics=("parallel",),
        ),
    )(x, w1, b1, w2, b2, w3, b3, w4, b4)

    return out[:B] if B_pad != B else out


def init_params(key):
    """Deterministic init mimicking nn.Linear default (uniform +/- 1/sqrt(fan_in)).

    Weights stored transposed vs. PyTorch, i.e. (in, out); biases kept (1, out)
    so they broadcast cleanly inside the kernel.
    """
    dims = [(INPUT_SIZE, HIDDEN1), (HIDDEN1, HIDDEN2),
            (HIDDEN2, HIDDEN3), (HIDDEN3, NUM_CLASSES)]
    params = {}
    keys = jax.random.split(key, 2 * len(dims))
    for idx, (fan_in, fan_out) in enumerate(dims):
        bound = 1.0 / (fan_in ** 0.5)
        wk, bk = keys[2 * idx], keys[2 * idx + 1]
        params[f"w{idx+1}"] = jax.random.uniform(
            wk, (fan_in, fan_out), jnp.float32, minval=-bound, maxval=bound)
        params[f"b{idx+1}"] = jax.random.uniform(
            bk, (1, fan_out), jnp.float32, minval=-bound, maxval=bound)
    return params


def prepare_params(params, dtype=jnp.float32):
    """One-time param prep (outside the hot path): cast weights to the compute
    dtype (bf16 recommended on v6e/v7x to halve weight/x DMA and feed the MXU
    natively); biases stay f32 for the f32 bias-add/ReLU."""
    out = {}
    for i in range(1, 5):
        out[f"w{i}"] = params[f"w{i}"].astype(dtype)
        out[f"b{i}"] = params[f"b{i}"].astype(jnp.float32)
    return out


def reference_forward(x, params):
    h = jnp.maximum(x @ params["w1"] + params["b1"], 0.0)
    h = jnp.maximum(h @ params["w2"] + params["b2"], 0.0)
    h = jnp.maximum(h @ params["w3"] + params["b3"], 0.0)
    return h @ params["w4"] + params["b4"]


if __name__ == "__main__":
    key = jax.random.PRNGKey(0)
    pkey, xkey1, xkey2 = jax.random.split(key, 3)
    raw_params = init_params(pkey)

    # --- f32 path (strict correctness check) -------------------------------
    params_f32 = prepare_params(raw_params, jnp.float32)

    # Small batch (exercises padding: 8 rows -> one 256-row tile).
    B_small = 8
    x_small = jax.random.normal(xkey1, (B_small, INPUT_SIZE), jnp.float32)
    out_small = jax.block_until_ready(neural_net_forward(x_small, params_f32))
    ref_small = reference_forward(x_small, raw_params)
    assert out_small.shape == (B_small, NUM_CLASSES), out_small.shape
    assert jnp.allclose(out_small, ref_small, atol=1e-5, rtol=1e-5), \
        "mismatch vs reference (small batch, f32)"

    # Non-multiple batch (cdiv padding, >1 grid step).
    B_odd = 300
    x_odd = jax.random.normal(xkey2, (B_odd, INPUT_SIZE), jnp.float32)
    out_odd = jax.block_until_ready(neural_net_forward(x_odd, params_f32))
    ref_odd = reference_forward(x_odd, raw_params)
    assert out_odd.shape == (B_odd, NUM_CLASSES), out_odd.shape
    assert jnp.allclose(out_odd, ref_odd, atol=1e-5, rtol=1e-5), \
        "mismatch vs reference (odd batch, f32)"

    # --- bf16 path (halved weight/x DMA on v6e/v7x; f32 accumulation) ------
    params_bf16 = prepare_params(raw_params, jnp.bfloat16)
    out_bf16 = jax.block_until_ready(neural_net_forward(x_odd, params_bf16))
    assert out_bf16.shape == (B_odd, NUM_CLASSES), out_bf16.shape
    assert jnp.allclose(out_bf16, ref_odd, atol=1e-1, rtol=1e-1), \
        "mismatch vs reference (odd batch, bf16)"

    print("KERNEL_OK")
</pallas_src>

<mosaic_0001>
module attributes {stable_mosaic.version = 11 : i64} {
  func.func @mlp_kernel(%arg0: i32, %arg1: memref<256x5xf32, #tpu.memory_space<vmem>>, %arg2: memref<5x256xf32, #tpu.memory_space<vmem>>, %arg3: memref<1x256xf32, #tpu.memory_space<vmem>>, %arg4: memref<256x64xf32, #tpu.memory_space<vmem>>, %arg5: memref<1x64xf32, #tpu.memory_space<vmem>>, %arg6: memref<64x36xf32, #tpu.memory_space<vmem>>, %arg7: memref<1x36xf32, #tpu.memory_space<vmem>>, %arg8: memref<36x2xf32, #tpu.memory_space<vmem>>, %arg9: memref<1x2xf32, #tpu.memory_space<vmem>>, %arg10: memref<256x2xf32, #tpu.memory_space<vmem>>) attributes {dimension_semantics = [#tpu.dimension_semantics<parallel>], iteration_bounds = array<i64: 1>, scalar_prefetch = 0 : i64, scratch_operands = 0 : i64, tpu.core_type = #tpu.core_type<tc>, window_params = [{transform_indices = @transform_0, window_bounds = array<i64: 256, 5>}, {pipeline_mode = #tpu.pipeline_mode<synchronous>, transform_indices = @transform_1, window_bounds = array<i64: 5, 256>}, {pipeline_mode = #tpu.pipeline_mode<synchronous>, transform_indices = @transform_2, window_bounds = array<i64: 1, 256>}, {pipeline_mode = #tpu.pipeline_mode<synchronous>, transform_indices = @transform_3, window_bounds = array<i64: 256, 64>}, {pipeline_mode = #tpu.pipeline_mode<synchronous>, transform_indices = @transform_4, window_bounds = array<i64: 1, 64>}, {pipeline_mode = #tpu.pipeline_mode<synchronous>, transform_indices = @transform_5, window_bounds = array<i64: 64, 36>}, {pipeline_mode = #tpu.pipeline_mode<synchronous>, transform_indices = @transform_6, window_bounds = array<i64: 1, 36>}, {pipeline_mode = #tpu.pipeline_mode<synchronous>, transform_indices = @transform_7, window_bounds = array<i64: 36, 2>}, {pipeline_mode = #tpu.pipeline_mode<synchronous>, transform_indices = @transform_8, window_bounds = array<i64: 1, 2>}, {transform_indices = @transform_9, window_bounds = array<i64: 256, 2>}]} {
    %c0 = arith.constant 0 : index
    %c0_0 = arith.constant 0 : index
    %0 = vector.load %arg1[%c0, %c0_0] : memref<256x5xf32, #tpu.memory_space<vmem>>, vector<256x5xf32>
    %c0_1 = arith.constant 0 : index
    %c0_2 = arith.constant 0 : index
    %1 = vector.load %arg2[%c0_1, %c0_2] : memref<5x256xf32, #tpu.memory_space<vmem>>, vector<5x256xf32>
    %cst = arith.constant dense<0.000000e+00> : vector<256x256xf32>
    %2 = tpu.matmul %0, %1, %cst {dimension_numbers = #tpu.dot_dimension_numbers<[1], [0], [0], [1], [0, 0, 1, 1], [], []>} : vector<256x5xf32>, vector<5x256xf32>, vector<256x256xf32> -> vector<256x256xf32>
    %c0_3 = arith.constant 0 : index
    %c0_4 = arith.constant 0 : index
    %3 = vector.load %arg3[%c0_3, %c0_4] : memref<1x256xf32, #tpu.memory_space<vmem>>, vector<1x256xf32>
    %4 = vector.broadcast %3 : vector<1x256xf32> to vector<256x256xf32>
    %5 = arith.addf %2, %4 : vector<256x256xf32>
    %cst_5 = arith.constant 0.000000e+00 : f32
    %6 = vector.broadcast %cst_5 : f32 to vector<256x256xf32>
    %7 = arith.maximumf %5, %6 : vector<256x256xf32>
    %c0_6 = arith.constant 0 : index
    %c0_7 = arith.constant 0 : index
    %8 = vector.load %arg4[%c0_6, %c0_7] : memref<256x64xf32, #tpu.memory_space<vmem>>, vector<256x64xf32>
    %cst_8 = arith.constant dense<0.000000e+00> : vector<256x64xf32>
    %9 = tpu.matmul %7, %8, %cst_8 {dimension_numbers = #tpu.dot_dimension_numbers<[1], [0], [0], [1], [0, 0, 1, 1], [], []>} : vector<256x256xf32>, vector<256x64xf32>, vector<256x64xf32> -> vector<256x64xf32>
    %c0_9 = arith.constant 0 : index
    %c0_10 = arith.constant 0 : index
    %10 = vector.load %arg5[%c0_9, %c0_10] : memref<1x64xf32, #tpu.memory_space<vmem>>, vector<1x64xf32>
    %11 = vector.broadcast %10 : vector<1x64xf32> to vector<256x64xf32>
    %12 = arith.addf %9, %11 : vector<256x64xf32>
    %cst_11 = arith.constant 0.000000e+00 : f32
    %13 = vector.broadcast %cst_11 : f32 to vector<256x64xf32>
    %14 = arith.maximumf %12, %13 : vector<256x64xf32>
    %c0_12 = arith.constant 0 : index
    %c0_13 = arith.constant 0 : index
    %15 = vector.load %arg6[%c0_12, %c0_13] : memref<64x36xf32, #tpu.memory_space<vmem>>, vector<64x36xf32>
    %cst_14 = arith.constant dense<0.000000e+00> : vector<256x36xf32>
    %16 = tpu.matmul %14, %15, %cst_14 {dimension_numbers = #tpu.dot_dimension_numbers<[1], [0], [0], [1], [0, 0, 1, 1], [], []>} : vector<256x64xf32>, vector<64x36xf32>, vector<256x36xf32> -> vector<256x36xf32>
    %c0_15 = arith.constant 0 : index
    %c0_16 = arith.constant 0 : index
    %17 = vector.load %arg7[%c0_15, %c0_16] : memref<1x36xf32, #tpu.memory_space<vmem>>, vector<1x36xf32>
    %18 = vector.broadcast %17 : vector<1x36xf32> to vector<256x36xf32>
    %19 = arith.addf %16, %18 : vector<256x36xf32>
    %cst_17 = arith.constant 0.000000e+00 : f32
    %20 = vector.broadcast %cst_17 : f32 to vector<256x36xf32>
    %21 = arith.maximumf %19, %20 : vector<256x36xf32>
    %c0_18 = arith.constant 0 : index
    %c0_19 = arith.constant 0 : index
    %22 = vector.load %arg8[%c0_18, %c0_19] : memref<36x2xf32, #tpu.memory_space<vmem>>, vector<36x2xf32>
    %cst_20 = arith.constant dense<0.000000e+00> : vector<256x2xf32>
    %23 = tpu.matmul %21, %22, %cst_20 {dimension_numbers = #tpu.dot_dimension_numbers<[1], [0], [0], [1], [0, 0, 1, 1], [], []>} : vector<256x36xf32>, vector<36x2xf32>, vector<256x2xf32> -> vector<256x2xf32>
    %c0_21 = arith.constant 0 : index
    %c0_22 = arith.constant 0 : index
    %24 = vector.load %arg9[%c0_21, %c0_22] : memref<1x2xf32, #tpu.memory_space<vmem>>, vector<1x2xf32>
    %25 = vector.broadcast %24 : vector<1x2xf32> to vector<256x2xf32>
    %26 = arith.addf %23, %25 : vector<256x2xf32>
    %c0_23 = arith.constant 0 : index
    %c0_24 = arith.constant 0 : index
    %27 = vector.load %arg10[%c0_23, %c0_24] : memref<256x2xf32, #tpu.memory_space<vmem>>, vector<256x2xf32>
    tpu.vector_store %arg10[%c0_23, %c0_24], %26 {strides = array<i32>} : memref<256x2xf32, #tpu.memory_space<vmem>>, vector<256x2xf32>,
    return
  }
  func.func @transform_0(%arg0: i32) -> (i32, i32) {
    %c0_i32 = arith.constant 0 : i32
    %c0_i32_0 = arith.constant 0 : i32
    return %arg0, %c0_i32 : i32, i32
  }
  func.func @transform_1(%arg0: i32) -> (i32, i32) {
    %c0_i32 = arith.constant 0 : i32
    %c0_i32_0 = arith.constant 0 : i32
    %c0_i32_1 = arith.constant 0 : i32
    return %c0_i32, %c0_i32_0 : i32, i32
  }
  func.func @transform_2(%arg0: i32) -> (i32, i32) {
    %c0_i32 = arith.constant 0 : i32
    %c0_i32_0 = arith.constant 0 : i32
    %c0_i32_1 = arith.constant 0 : i32
    return %c0_i32, %c0_i32_0 : i32, i32
  }
  func.func @transform_3(%arg0: i32) -> (i32, i32) {
    %c0_i32 = arith.constant 0 : i32
    %c0_i32_0 = arith.constant 0 : i32
    %c0_i32_1 = arith.constant 0 : i32
    return %c0_i32, %c0_i32_0 : i32, i32
  }
  func.func @transform_4(%arg0: i32) -> (i32, i32) {
    %c0_i32 = arith.constant 0 : i32
    %c0_i32_0 = arith.constant 0 : i32
    %c0_i32_1 = arith.constant 0 : i32
    return %c0_i32, %c0_i32_0 : i32, i32
  }
  func.func @transform_5(%arg0: i32) -> (i32, i32) {
    %c0_i32 = arith.constant 0 : i32
    %c0_i32_0 = arith.constant 0 : i32
    %c0_i32_1 = arith.constant 0 : i32
    return %c0_i32, %c0_i32_0 : i32, i32
  }
  func.func @transform_6(%arg0: i32) -> (i32, i32) {
    %c0_i32 = arith.constant 0 : i32
    %c0_i32_0 = arith.constant 0 : i32
    %c0_i32_1 = arith.constant 0 : i32
    return %c0_i32, %c0_i32_0 : i32, i32
  }
  func.func @transform_7(%arg0: i32) -> (i32, i32) {
    %c0_i32 = arith.constant 0 : i32
    %c0_i32_0 = arith.constant 0 : i32
    %c0_i32_1 = arith.constant 0 : i32
    return %c0_i32, %c0_i32_0 : i32, i32
  }
  func.func @transform_8(%arg0: i32) -> (i32, i32) {
    %c0_i32 = arith.constant 0 : i32
    %c0_i32_0 = arith.constant 0 : i32
    %c0_i32_1 = arith.constant 0 : i32
    return %c0_i32, %c0_i32_0 : i32, i32
  }
  func.func @transform_9(%arg0: i32) -> (i32, i32) {
    %c0_i32 = arith.constant 0 : i32
    %c0_i32_0 = arith.constant 0 : i32
    return %arg0, %c0_i32 : i32, i32
  }
}

</mosaic_0001>

<bundles_post_ra>
// kernel: neural_net_forward.1
= control target key start
LH: loop header
LB: loop body
LE: loop exit
PB: predicated region body
PF: predicated region fallthrough
CT: control target
= control target key end

     0   :  { %vm169_vm0 = vcmask 1044480   ;;  %vm72_vm1 = vcmask 39936   ;;  %vm1120_vm2 = vcmask 1043456   ;;  %vm772_vm3 = vcmask 523264   ;;  %s2244_s1 = inlined_call_operand.vmem [shape: f32[5,256], index: 1, kind: input, shape index: {}]   ;;  %s2245_s0 = inlined_call_operand.vmem [shape: f32[256,5], index: 0, kind: input, shape index: {}]   ;;  %s2246_s3 = inlined_call_operand.vmem [shape: f32[256,64], index: 3, kind: input, shape index: {}]   ;;  %s2247_s5 = inlined_call_operand.vmem [shape: f32[64,36], index: 5, kind: input, shape index: {}]   ;;  %s2248_s2 = inlined_call_operand.vmem [shape: f32[1,256], index: 2, kind: input, shape index: {}]   ;;  %s2249_s4 = inlined_call_operand.vmem [shape: f32[1,64], index: 4, kind: input, shape index: {}]   ;;  %s2250_s7 = inlined_call_operand.vmem [shape: f32[36,2], index: 7, kind: input, shape index: {}]   ;;  %s2251_s6 = inlined_call_operand.vmem [shape: f32[1,36], index: 6, kind: input, shape index: {}]   ;;  %s2252_s8 = inlined_call_operand.vmem [shape: f32[1,2], index: 8, kind: input, shape index: {}]   ;;  %s2253_s9 = inlined_call_operand.vmem [shape: f32[256,2], index: 9, kind: output, shape index: {}]  }
   0x1   :  { %v64_v0 = vld [vmem:[%s2244_s1] sm:$0x1f]  ;;  %v65_v1 = vld [vmem:[%s2244_s1 + $0x8] sm:$0x1f]  ;;  %v497_v4 = vld [vmem:[%s2246_s3 + $0xf8] sm:$0xff]  ;;  %vm1023_vm4 = vcmask 293888  }
   0x2   :  { %v32_v2 = vld [vmem:[%s2245_s0] sm:$0xff]  ;;  %1274 = vmatpush.msk.msra.mxu0 %vm169_vm0, %v64_v0  ;;  %1307 = vmatpush.msk.msra.mxu1 %vm169_vm0, %v65_v1  ;;  %v49_v5 = vld [vmem:[%s2245_s0 + $0x88] sm:$0xff]  ;;  %v481_v6 = vld [vmem:[%s2246_s3 + $0x78] sm:$0xff]  ;;  %vm1237_vm5 = vcmask 15360  }
   0x3   :  { %v1482_v3 = vld [vmem:[%s2245_s0 + $0x80] sm:$0xff]  ;;  %1275 = vmatmul.msk.f32.vlgmr.msra.gmra.mxu0 %vm72_vm1, %v32_v2  ;;  %1308 = vmatmul.msk.f32.vlgmr.msra.gmra.mxu1 %vm72_vm1, %v32_v2  ;;  %v496_v7 = vld [vmem:[%s2246_s3 + $0xf0] sm:$0xff]  ;;  %v495_v9 = vld [vmem:[%s2246_s3 + $0xe8] sm:$0xff] }
   0x4   :  { %1406 = vmatpush.msk.msra.mxu3 %vm169_vm0, %v65_v1  ;;  %1405 = vmatpush.msk.msra.mxu2 %vm169_vm0, %v64_v0  ;;  %v480_v8 = vld [vmem:[%s2246_s3 + $0x70] sm:$0xff]  ;;  %v479_v10 = vld [vmem:[%s2246_s3 + $0x68] sm:$0xff]  ;;  %v494_v12 = vld [vmem:[%s2246_s3 + $0xe0] sm:$0xff] }
   0x5   :  { %1324 = vmatmul.msk.f32.vlgmr.msra.gmra.mxu3 %vm72_vm1, %v1482_v3  ;;  %1292 = vmatmul.msk.f32.vlgmr.msra.gmra.mxu2 %vm72_vm1, %v49_v5  ;;  %v33_v11 = vld [vmem:[%s2245_s0 + $0x8] sm:$0xff]  ;;  %v478_v13 = vld [vmem:[%s2246_s3 + $0x60] sm:$0xff]  ;;  %v50_v14 = vld [vmem:[%s2245_s0 + $0x90] sm:$0xff] }
   0x6   :  { %615 = vmatpush.msrb.mxu3 %v497_v4  ;;  %502 = vmatpush.msrb.mxu2 %v481_v6  ;;  %v493_v15 = vld [vmem:[%s2246_s3 + $0xd8] sm:$0xff]  ;;  %v492_v17 = vld [vmem:[%s2246_s3 + $0xd0] sm:$0xff]  ;;  %v491_v21 = vld [vmem:[%s2246_s3 + $0xc8] sm:$0xff] }
   0x7   :  { %v477_v16 = vld [vmem:[%s2246_s3 + $0x58] sm:$0xff]  ;;  %v34_v18 = vld [vmem:[%s2245_s0 + $0x10] sm:$0xff]  ;;  %v475_v22 = vld [vmem:[%s2246_s3 + $0x48] sm:$0xff] }
   0x8   :  { %616 = vmatpush.msrb.mxu3 %v496_v7  ;;  %503 = vmatpush.msrb.mxu2 %v480_v8  ;;  %v51_v19 = vld [vmem:[%s2245_s0 + $0x98] sm:$0xff]  ;;  %v476_v20 = vld [vmem:[%s2246_s3 + $0x50] sm:$0xff]  ;;  %v52_v24 = vld [vmem:[%s2245_s0 + $0xa0] sm:$0xff] }
   0x9   :  { %v35_v23 = vld [vmem:[%s2245_s0 + $0x18] sm:$0xff]  ;;  %v490_v25 = vld [vmem:[%s2246_s3 + $0xc0] sm:$0xff]  ;;  %v53_v28 = vld [vmem:[%s2245_s0 + $0xa8] sm:$0xff] }
   0xa   :  { %617 = vmatpush.msrb.mxu3 %v495_v9  ;;  %504 = vmatpush.msrb.mxu2 %v479_v10  ;;  %v474_v26 = vld [vmem:[%s2246_s3 + $0x40] sm:$0xff]  ;;  %v489_v29 = vld [vmem:[%s2246_s3 + $0xb8] sm:$0xff]  ;;  %v37_v31 = vld [vmem:[%s2245_s0 + $0x28] sm:$0xff] }
   0xb   :  { %1276 = vmatmul.msk.f32.gmra.mxu0 %vm72_vm1, %v33_v11  ;;  %1309 = vmatmul.msk.f32.gmra.mxu1 %vm72_vm1, %v33_v11  ;;  %v36_v27 = vld [vmem:[%s2245_s0 + $0x20] sm:$0xff]  ;;  %v473_v30 = vld [vmem:[%s2246_s3 + $0x38] sm:$0xff]  ;;  %v54_v32 = vld [vmem:[%s2245_s0 + $0xb0] sm:$0xff] }
   0xc   :  { %618 = vmatpush.msrb.mxu3 %v494_v12  ;;  %505 = vmatpush.msrb.mxu2 %v478_v13  ;;  %v488_v33 = vld [vmem:[%s2246_s3 + $0xb0] sm:$0xff]  ;;  %v55_v36 = vld [vmem:[%s2245_s0 + $0xb8] sm:$0xff]  ;;  %v487_v37 = vld [vmem:[%s2246_s3 + $0xa8] sm:$0xff] }
   0xd   :  { %1325 = vmatmul.msk.f32.gmra.mxu3 %vm72_vm1, %v49_v5  ;;  %1293 = vmatmul.msk.f32.gmra.mxu2 %vm72_vm1, %v50_v14  ;;  %v472_v34 = vld [vmem:[%s2246_s3 + $0x30] sm:$0xff]  ;;  %v471_v38 = vld [vmem:[%s2246_s3 + $0x28] sm:$0xff]  ;;  %v39_v39 = vld [vmem:[%s2245_s0 + $0x38] sm:$0xff] }
   0xe   :  { %619 = vmatpush.msrb.mxu3 %v493_v15  ;;  %506 = vmatpush.msrb.mxu2 %v477_v16  ;;  %v38_v35 = vld [vmem:[%s2245_s0 + $0x30] sm:$0xff]  ;;  %v56_v40 = vld [vmem:[%s2245_s0 + $0xc0] sm:$0xff]  ;;  %v57_v44 = vld [vmem:[%s2245_s0 + $0xc8] sm:$0xff] }
   0xf   :  { %v486_v41 = vld [vmem:[%s2246_s3 + $0xa0] sm:$0xff]  ;;  %v469_v45 = vld [vmem:[%s2246_s3 + $0x18] sm:$0xff]  ;;  %v41_v47 = vld [vmem:[%s2245_s0 + $0x48] sm:$0xff] }
  0x10   :  { %620 = vmatpush.msrb.mxu3 %v492_v17  ;;  %507 = vmatpush.msrb.mxu2 %v476_v20  ;;  %v470_v42 = vld [vmem:[%s2246_s3 + $0x20] sm:$0xff]  ;;  %v485_v46 = vld [vmem:[%s2246_s3 + $0x98] sm:$0xff]  ;;  %v58_v48 = vld [vmem:[%s2245_s0 + $0xd0] sm:$0xff] }
  0x11   :  { %v40_v43 = vld [vmem:[%s2245_s0 + $0x40] sm:$0xff]  ;;  %v468_v49 = vld [vmem:[%s2246_s3 + $0x10] sm:$0xff]  ;;  %v59_v52 = vld [vmem:[%s2245_s0 + $0xd8] sm:$0xff] }
  0x12   :  { %621 = vmatpush.msrb.mxu3 %v491_v21  ;;  %508 = vmatpush.msrb.mxu2 %v475_v22  ;;  %v484_v50 = vld [vmem:[%s2246_s3 + $0x90] sm:$0xff]  ;;  %v467_v53 = vld [vmem:[%s2246_s3 + $0x8] sm:$0xff]  ;;  %v43_v55 = vld [vmem:[%s2245_s0 + $0x58] sm:$0xff] }
  0x13   :  { %1277 = vmatmul.msk.f32.gmra.mxu0 %vm72_vm1, %v34_v18  ;;  %1310 = vmatmul.msk.f32.gmra.mxu1 %vm72_vm1, %v34_v18  ;;  %v42_v51 = vld [vmem:[%s2245_s0 + $0x50] sm:$0xff]  ;;  %v483_v54 = vld [vmem:[%s2246_s3 + $0x88] sm:$0xff]  ;;  %v60_v56 = vld [vmem:[%s2245_s0 + $0xe0] sm:$0xff] }
  0x14   :  { %622 = vmatpush.msrb.mxu3 %v490_v25  ;;  %509 = vmatpush.msrb.mxu2 %v474_v26  ;;  %v466_v57 = vld [vmem:[%s2246_s3] sm:$0xff]  ;;  %v61_v60 = vld [vmem:[%s2245_s0 + $0xe8] sm:$0xff]  ;;  %v62_v62 = vld [vmem:[%s2245_s0 + $0xf0] sm:$0xff] }
  0x15   :  { %1326 = vmatmul.msk.f32.gmra.mxu3 %vm72_vm1, %v50_v14  ;;  %1294 = vmatmul.msk.f32.gmra.mxu2 %vm72_vm1, %v51_v19  ;;  %v482_v58 = vld [vmem:[%s2246_s3 + $0x80] sm:$0xff]  ;;  %v45_v61 = vld [vmem:[%s2245_s0 + $0x68] sm:$0xff]  ;;  %v767_v63 = vld [vmem:[%s2247_s5 + $0x38] sm:$0xff] }
  0x16   :  { %623 = vmatpush.msrb.mxu3 %v489_v29  ;;  %510 = vmatpush.msrb.mxu2 %v473_v30  ;;  %v44_v59 = vld [vmem:[%s2245_s0 + $0x60] sm:$0xff]  ;;  %v46_v0 = vld [vmem:[%s2245_s0 + $0x70] sm:$0xff]  ;;  %v63_v1 = vld [vmem:[%s2245_s0 + $0xf8] sm:$0xff] }
  0x17   :  { %877 = vmatpush.msrb.mxu0 %v767_v63  ;;  %v47_v2 = vld [vmem:[%s2245_s0 + $0x78] sm:$0xff]  ;;  %v66_v4 = vld [vmem:[%s2248_s2] sm:$0x3]  ;;  %v766_v7 = vld [vmem:[%s2247_s5 + $0x30] sm:$0xff] }
  0x18   :  { %624 = vmatpush.msrb.mxu3 %v488_v33  ;;  %511 = vmatpush.msrb.mxu2 %v472_v34  ;;  %v1742_v5 = vperm.slane %v66_v4, 0  ;;  %v1744_v6 = vperm.slane %v66_v4, 1 }
  0x19   :  { %878 = vmatpush.msrb.mxu0 %v766_v7 }
  0x1a   :  { %625 = vmatpush.msrb.mxu3 %v487_v37  ;;  %512 = vmatpush.msrb.mxu2 %v471_v38 }
  0x1b   :  { %1278 = vmatmul.msk.f32.gmra.mxu0 %vm72_vm1, %v35_v23  ;;  %1311 = vmatmul.msk.f32.gmra.mxu1 %vm72_vm1, %v35_v23 }
  0x1c   :  { %626 = vmatpush.msrb.mxu3 %v486_v41  ;;  %513 = vmatpush.msrb.mxu2 %v470_v42 }
  0x1d   :  { %1327 = vmatmul.msk.f32.gmra.mxu3 %vm72_vm1, %v51_v19  ;;  %1295 = vmatmul.msk.f32.gmra.mxu2 %vm72_vm1, %v52_v24 }
  0x1e   :  { %514 = vmatpush.msrb.mxu2 %v469_v45  ;;  %627 = vmatpush.msrb.mxu3 %v485_v46  ;;  %v764_v46 = vld [vmem:[%s2247_s5 + $0x20] sm:$0xff] }
  0x20   :  { %515 = vmatpush.msrb.mxu2 %v468_v49  ;;  %628 = vmatpush.msrb.mxu3 %v484_v50 }
  0x22   :  { %516 = vmatpush.msrb.mxu2 %v467_v53  ;;  %629 = vmatpush.msrb.mxu3 %v483_v54 }
  0x23   :  { %1279 = vmatmul.msk.f32.gmra.mxu0 %vm72_vm1, %v36_v27  ;;  %1312 = vmatmul.msk.f32.gmra.mxu1 %vm72_vm1, %v36_v27 }
  0x24   :  { %517 = vmatpush.msrb.mxu2 %v466_v57  ;;  %630 = vmatpush.msrb.mxu3 %v482_v58 }
  0x25   :  { %1328 = vmatmul.msk.f32.gmra.mxu3 %vm72_vm1, %v52_v24  ;;  %1296 = vmatmul.msk.f32.gmra.mxu2 %vm72_vm1, %v53_v28 }
  0x26   :  { %1407 = vmatpush.msra.mxu2 %v767_v63  ;;  %v763_v63 = vld [vmem:[%s2247_s5 + $0x18] sm:$0xff] }
  0x28   :  { %1408 = vmatpush.msra.mxu2 %v766_v7 }
  0x2b   :  { %1280 = vmatmul.msk.f32.gmra.mxu0 %vm72_vm1, %v37_v31  ;;  %1313 = vmatmul.msk.f32.gmra.mxu1 %vm72_vm1, %v37_v31 }
  0x2d   :  { %1329 = vmatmul.msk.f32.gmra.mxu3 %vm72_vm1, %v53_v28  ;;  %1297 = vmatmul.msk.f32.gmra.mxu2 %vm72_vm1, %v54_v32 }
  0x33   :  { %1281 = vmatmul.msk.f32.gmra.mxu0 %vm72_vm1, %v38_v35  ;;  %1314 = vmatmul.msk.f32.gmra.mxu1 %vm72_vm1, %v38_v35 }
  0x35   :  { %1330 = vmatmul.msk.f32.gmra.mxu3 %vm72_vm1, %v54_v32  ;;  %1298 = vmatmul.msk.f32.gmra.mxu2 %vm72_vm1, %v55_v36 }
  0x3b   :  { %1282 = vmatmul.msk.f32.gmra.mxu0 %vm72_vm1, %v39_v39  ;;  %1315 = vmatmul.msk.f32.gmra.mxu1 %vm72_vm1, %v39_v39 }
  0x3d   :  { %1331 = vmatmul.msk.f32.gmra.mxu3 %vm72_vm1, %v55_v36  ;;  %1299 = vmatmul.msk.f32.gmra.mxu2 %vm72_vm1, %v56_v40 }
  0x43   :  { %1283 = vmatmul.msk.f32.gmra.mxu0 %vm72_vm1, %v40_v43  ;;  %1316 = vmatmul.msk.f32.gmra.mxu1 %vm72_vm1, %v40_v43 }
  0x45   :  { %1332 = vmatmul.msk.f32.gmra.mxu3 %vm72_vm1, %v56_v40  ;;  %1300 = vmatmul.msk.f32.gmra.mxu2 %vm72_vm1, %v57_v44 }
  0x4b   :  { %1284 = vmatmul.msk.f32.gmra.mxu0 %vm72_vm1, %v41_v47  ;;  %1317 = vmatmul.msk.f32.gmra.mxu1 %vm72_vm1, %v41_v47 }
  0x4d   :  { %1333 = vmatmul.msk.f32.gmra.mxu3 %vm72_vm1, %v57_v44  ;;  %1301 = vmatmul.msk.f32.gmra.mxu2 %vm72_vm1, %v58_v48 }
  0x53   :  { %1285 = vmatmul.msk.f32.gmra.mxu0 %vm72_vm1, %v42_v51  ;;  %1318 = vmatmul.msk.f32.gmra.mxu1 %vm72_vm1, %v42_v51 }
  0x55   :  { %1334 = vmatmul.msk.f32.gmra.mxu3 %vm72_vm1, %v58_v48  ;;  %1302 = vmatmul.msk.f32.gmra.mxu2 %vm72_vm1, %v59_v52 }
  0x5b   :  { %1286 = vmatmul.msk.f32.gmra.mxu0 %vm72_vm1, %v43_v55  ;;  %1319 = vmatmul.msk.f32.gmra.mxu1 %vm72_vm1, %v43_v55 }
  0x5d   :  { %1335 = vmatmul.msk.f32.gmra.mxu3 %vm72_vm1, %v59_v52  ;;  %1303 = vmatmul.msk.f32.gmra.mxu2 %vm72_vm1, %v60_v56 }
  0x63   :  { %1287 = vmatmul.msk.f32.gmra.mxu0 %vm72_vm1, %v44_v59  ;;  %1320 = vmatmul.msk.f32.gmra.mxu1 %vm72_vm1, %v44_v59 }
  0x65   :  { %1336 = vmatmul.msk.f32.gmra.mxu3 %vm72_vm1, %v60_v56  ;;  %1304 = vmatmul.msk.f32.gmra.mxu2 %vm72_vm1, %v61_v60 }
  0x6b   :  { %1288 = vmatmul.msk.f32.gmra.mxu0 %vm72_vm1, %v45_v61  ;;  %1321 = vmatmul.msk.f32.gmra.mxu1 %vm72_vm1, %v45_v61 }
  0x6d   :  { %1337 = vmatmul.msk.f32.gmra.mxu3 %vm72_vm1, %v61_v60  ;;  %1305 = vmatmul.msk.f32.gmra.mxu2 %vm72_vm1, %v62_v62 }
  0x73   :  { %1289 = vmatmul.msk.f32.gmra.mxu0 %vm72_vm1, %v46_v0  ;;  %1322 = vmatmul.msk.f32.gmra.mxu1 %vm72_vm1, %v46_v0 }
  0x75   :  { %1338 = vmatmul.msk.f32.gmra.mxu3 %vm72_vm1, %v62_v62  ;;  %1306 = vmatmul.msk.f32.gmra.mxu2 %vm72_vm1, %v63_v1 }
  0x7b   :  { %1290 = vmatmul.msk.f32.gmra.mxu0 %vm72_vm1, %v47_v2  ;;  %1323 = vmatmul.msk.f32.gmra.mxu1 %vm72_vm1, %v47_v2 }
  0x7d   :  { %1339 = vmatmul.msk.f32.gmra.mxu3 %vm72_vm1, %v63_v1 }
  0x80   :  { %v193_v8 = vpop.f32.mrf.mxu0  ;;  %v306_v9 = vpop.f32.mrf.mxu1 }
  0x81   :  { %v194_v10 = vadd.f32 %v193_v8, %v1742_v5  ;;  %v307_v11 = vadd.f32 %v306_v9, %v1744_v6 }
  0x83   :  { %v402_v12 = vmax.f32 %v194_v10, 0.0  ;;  %v403_v13 = vmax.f32 %v307_v11, 0.0  ;;  %1291 = vmatmul.msk.f32.gmra.mxu0 %vm72_vm1, %v1482_v3  ;;  %v765_v3 = vld [vmem:[%s2247_s5 + $0x28] sm:$0xff] }
  0x84   :  { %879 = vmatpush.msrb.mxu0 %v765_v3  ;;  %1409 = vmatpush.msra.mxu2 %v765_v3 }
  0x85   :  { %518 = vmatmul.f32.vlgmr.msrb.gmra.mxu2 %v402_v12  ;;  %631 = vmatmul.f32.vlgmr.msrb.gmra.mxu3 %v403_v13 }
  0x86   :  { %880 = vmatpush.msrb.mxu0 %v764_v46  ;;  %1410 = vmatpush.msra.mxu2 %v764_v46 }
  0x88   :  { %v196_v14 = vpop.f32.mrf.mxu0  ;;  %v309_v15 = vpop.f32.mrf.mxu1  ;;  %881 = vmatpush.msrb.mxu0 %v763_v63  ;;  %1411 = vmatpush.msra.mxu2 %v763_v63 }
  0x89   :  { %v197_v16 = vadd.f32 %v196_v14, %v1742_v5  ;;  %v310_v17 = vadd.f32 %v309_v15, %v1744_v6  ;;  %v1755_v18 = vpop.f32.mrf.mxu3  ;;  %v1757_v19 = vpop.f32.mrf.mxu2 }
  0x8b   :  { %v404_v20 = vmax.f32 %v197_v16, 0.0  ;;  %v405_v21 = vmax.f32 %v310_v17, 0.0 }
  0x8d   :  { %521 = vmatmul.f32.gmra.mxu2 %v404_v20  ;;  %634 = vmatmul.f32.gmra.mxu3 %v405_v21  ;;  %v762_v21 = vld [vmem:[%s2247_s5 + $0x10] sm:$0xff] }
  0x8e   :  { %882 = vmatpush.msrb.mxu0 %v762_v21  ;;  %1412 = vmatpush.msra.mxu2 %v762_v21 }
  0x90   :  { %v199_v22 = vpop.f32.mrf.mxu0  ;;  %v312_v23 = vpop.f32.mrf.mxu1 }
  0x91   :  { %v200_v24 = vadd.f32 %v199_v22, %v1742_v5  ;;  %v313_v25 = vadd.f32 %v312_v23, %v1744_v6  ;;  %v1764_v26 = vpop.f32.mrf.mxu3  ;;  %v1766_v27 = vpop.f32.mrf.mxu2 }
  0x93   :  { %v406_v28 = vmax.f32 %v200_v24, 0.0  ;;  %v407_v29 = vmax.f32 %v313_v25, 0.0 }
  0x95   :  { %524 = vmatmul.f32.gmra.mxu2 %v406_v28  ;;  %637 = vmatmul.f32.gmra.mxu3 %v407_v29 }
  0x98   :  { %v202_v30 = vpop.f32.mrf.mxu0  ;;  %v315_v31 = vpop.f32.mrf.mxu1 }
  0x99   :  { %v203_v32 = vadd.f32 %v202_v30, %v1742_v5  ;;  %v316_v33 = vadd.f32 %v315_v31, %v1744_v6  ;;  %v1770_v34 = vpop.f32.mrf.mxu3  ;;  %v1772_v35 = vpop.f32.mrf.mxu2 }
  0x9b   :  { %v408_v36 = vmax.f32 %v203_v32, 0.0  ;;  %v409_v37 = vmax.f32 %v316_v33, 0.0 }
  0x9d   :  { %527 = vmatmul.f32.gmra.mxu2 %v408_v36  ;;  %640 = vmatmul.f32.gmra.mxu3 %v409_v37 }
  0xa0   :  { %v205_v38 = vpop.f32.mrf.mxu0  ;;  %v318_v39 = vpop.f32.mrf.mxu1 }
  0xa1   :  { %v206_v40 = vadd.f32 %v205_v38, %v1742_v5  ;;  %v319_v41 = vadd.f32 %v318_v39, %v1744_v6  ;;  %v1776_v42 = vpop.f32.mrf.mxu3  ;;  %v1778_v43 = vpop.f32.mrf.mxu2 }
  0xa3   :  { %v410_v44 = vmax.f32 %v206_v40, 0.0  ;;  %v411_v45 = vmax.f32 %v319_v41, 0.0  ;;  %v761_v41 = vld [vmem:[%s2247_s5 + $0x8] sm:$0xff] }
  0xa4   :  { %883 = vmatpush.msrb.mxu0 %v761_v41  ;;  %1413 = vmatpush.msra.mxu2 %v761_v41 }
  0xa5   :  { %530 = vmatmul.f32.gmra.mxu2 %v410_v44  ;;  %643 = vmatmul.f32.gmra.mxu3 %v411_v45 }
  0xa8   :  { %v208_v47 = vpop.f32.mrf.mxu0  ;;  %v321_v48 = vpop.f32.mrf.mxu1 }
  0xa9   :  { %v209_v49 = vadd.f32 %v208_v47, %v1742_v5  ;;  %v322_v50 = vadd.f32 %v321_v48, %v1744_v6  ;;  %v1785_v51 = vpop.f32.mrf.mxu3  ;;  %v1787_v52 = vpop.f32.mrf.mxu2 }
  0xab   :  { %v412_v53 = vmax.f32 %v209_v49, 0.0  ;;  %v413_v54 = vmax.f32 %v322_v50, 0.0 }
  0xad   :  { %533 = vmatmul.f32.gmra.mxu2 %v412_v53  ;;  %646 = vmatmul.f32.gmra.mxu3 %v413_v54 }
  0xb0   :  { %v211_v55 = vpop.f32.mrf.mxu0  ;;  %v324_v56 = vpop.f32.mrf.mxu1 }
  0xb1   :  { %v212_v57 = vadd.f32 %v211_v55, %v1742_v5  ;;  %v325_v58 = vadd.f32 %v324_v56, %v1744_v6  ;;  %v1791_v59 = vpop.f32.mrf.mxu3  ;;  %v1793_v60 = vpop.f32.mrf.mxu2 }
  0xb3   :  { %v414_v61 = vmax.f32 %v212_v57, 0.0  ;;  %v415_v62 = vmax.f32 %v325_v58, 0.0 }
  0xb5   :  { %536 = vmatmul.f32.gmra.mxu2 %v414_v61  ;;  %649 = vmatmul.f32.gmra.mxu3 %v415_v62 }
  0xb8   :  { %v214_v0 = vpop.f32.mrf.mxu0  ;;  %v327_v1 = vpop.f32.mrf.mxu1 }
  0xb9   :  { %v215_v2 = vadd.f32 %v214_v0, %v1742_v5  ;;  %v328_v4 = vadd.f32 %v327_v1, %v1744_v6  ;;  %v1800_v7 = vpop.f32.mrf.mxu3  ;;  %v1802_v8 = vpop.f32.mrf.mxu2  ;;  %v760_v0 = vld [vmem:[%s2247_s5] sm:$0xff] }
  0xba   :  { %884 = vmatpush.msrb.mxu0 %v760_v0  ;;  %1414 = vmatpush.msra.mxu2 %v760_v0 }
  0xbb   :  { %v416_v9 = vmax.f32 %v215_v2, 0.0  ;;  %v417_v10 = vmax.f32 %v328_v4, 0.0 }
  0xbd   :  { %539 = vmatmul.f32.gmra.mxu2 %v416_v9  ;;  %652 = vmatmul.f32.gmra.mxu3 %v417_v10 }
  0xc0   :  { %v217_v11 = vpop.f32.mrf.mxu0  ;;  %v330_v12 = vpop.f32.mrf.mxu1 }
  0xc1   :  { %v218_v13 = vadd.f32 %v217_v11, %v1742_v5  ;;  %v331_v14 = vadd.f32 %v330_v12, %v1744_v6  ;;  %v1806_v15 = vpop.f32.mrf.mxu3  ;;  %v1808_v16 = vpop.f32.mrf.mxu2 }
  0xc3   :  { %v419_v17 = vmax.f32 %v331_v14, 0.0  ;;  %v418_v20 = vmax.f32 %v218_v13, 0.0 }
  0xc5   :  { %542 = vmatmul.f32.gmra.mxu2 %v418_v20  ;;  %655 = vmatmul.f32.gmra.mxu3 %v419_v17 }
  0xc8   :  { %v220_v3 = vpop.f32.mrf.mxu0  ;;  %v333_v22 = vpop.f32.mrf.mxu1 }
  0xc9   :  { %v221_v23 = vadd.f32 %v220_v3, %v1742_v5  ;;  %v334_v24 = vadd.f32 %v333_v22, %v1744_v6  ;;  %v1815_v25 = vpop.f32.mrf.mxu3  ;;  %v1817_v28 = vpop.f32.mrf.mxu2 }
  0xcb   :  { %v420_v29 = vmax.f32 %v221_v23, 0.0  ;;  %v421_v30 = vmax.f32 %v334_v24, 0.0 }
  0xcd   :  { %545 = vmatmul.f32.gmra.mxu2 %v420_v29  ;;  %658 = vmatmul.f32.gmra.mxu3 %v421_v30  ;;  %v1018_v29 = vld [vmem:[%s2250_s7 + $0x20] sm:$0xf] }
  0xce   :  { %1372 = vmatpush.msk.msrb.mxu1 %vm1120_vm2, %v1018_v29 }
  0xd0   :  { %v223_v31 = vpop.f32.mrf.mxu0  ;;  %v336_v32 = vpop.f32.mrf.mxu1 }
  0xd1   :  { %v224_v33 = vadd.f32 %v223_v31, %v1742_v5  ;;  %v337_v36 = vadd.f32 %v336_v32, %v1744_v6  ;;  %v1821_v37 = vpop.f32.mrf.mxu3  ;;  %v1823_v38 = vpop.f32.mrf.mxu2 }
  0xd3   :  { %v422_v39 = vmax.f32 %v224_v33, 0.0  ;;  %v423_v40 = vmax.f32 %v337_v36, 0.0 }
  0xd5   :  { %548 = vmatmul.f32.gmra.mxu2 %v422_v39  ;;  %661 = vmatmul.f32.gmra.mxu3 %v423_v40 }
  0xd8   :  { %v226_v44 = vpop.f32.mrf.mxu0  ;;  %v339_v45 = vpop.f32.mrf.mxu1 }
  0xd9   :  { %v227_v46 = vadd.f32 %v226_v44, %v1742_v5  ;;  %v340_v47 = vadd.f32 %v339_v45, %v1744_v6  ;;  %v1830_v48 = vpop.f32.mrf.mxu3  ;;  %v1832_v49 = vpop.f32.mrf.mxu2  ;;  %v355_v44 = vadd.f32 %v1755_v18, %v1744_v6  ;;  %v358_v18 = vadd.f32 %v1764_v26, %v1744_v6 }
  0xdb   :  { %v424_v50 = vmax.f32 %v227_v46, 0.0  ;;  %v425_v53 = vmax.f32 %v340_v47, 0.0  ;;  %v437_v0 = vmax.f32 %v358_v18, 0.0 }
  0xdd   :  { %551 = vmatmul.f32.gmra.mxu2 %v424_v50  ;;  %664 = vmatmul.f32.gmra.mxu3 %v425_v53  ;;  %v435_v50 = vmax.f32 %v355_v44, 0.0 }
  0xe0   :  { %v229_v54 = vpop.f32.mrf.mxu0  ;;  %v342_v55 = vpop.f32.mrf.mxu1 }
  0xe1   :  { %v230_v56 = vadd.f32 %v229_v54, %v1742_v5  ;;  %v343_v57 = vadd.f32 %v342_v55, %v1744_v6  ;;  %v1836_v58 = vpop.f32.mrf.mxu3  ;;  %v1838_v61 = vpop.f32.mrf.mxu2  ;;  %v1872_v54 = vld [vmem:[%s2249_s4] ss:$0 sm:$0xff]  ;;  %v245_v55 = vadd.f32 %v1757_v19, %v1742_v5  ;;  %v361_v19 = vadd.f32 %v1770_v34, %v1744_v6 }
  0xe2   :  { %v364_v34 = vadd.f32 %v1776_v42, %v1744_v6 }
  0xe3   :  { %v426_v62 = vmax.f32 %v230_v56, 0.0  ;;  %v427_v63 = vmax.f32 %v343_v57, 0.0 }
  0xe5   :  { %554 = vmatmul.f32.gmra.mxu2 %v426_v62  ;;  %667 = vmatmul.f32.gmra.mxu3 %v427_v63  ;;  %v436_v63 = vmax.f32 %v245_v55, 0.0  ;;  %v257_v55 = vadd.f32 %v1787_v52, %v1742_v5  ;;  %v260_v52 = vadd.f32 %v1793_v60, %v1742_v5  ;;  %v376_v60 = vadd.f32 %v1806_v15, %v1744_v6 }
  0xe8   :  { %v232_v1 = vpop.f32.mrf.mxu0  ;;  %v345_v2 = vpop.f32.mrf.mxu1 }
  0xe9   :  { %v233_v4 = vadd.f32 %v232_v1, %v1742_v5  ;;  %v346_v9 = vadd.f32 %v345_v2, %v1744_v6  ;;  %v1845_v10 = vpop.f32.mrf.mxu3  ;;  %v1847_v11 = vpop.f32.mrf.mxu2 }
  0xeb   :  { %v428_v12 = vmax.f32 %v233_v4, 0.0  ;;  %v429_v13 = vmax.f32 %v346_v9, 0.0  ;;  %v248_v4 = vadd.f32 %v1766_v27, %v1742_v5  ;;  %v251_v27 = vadd.f32 %v1772_v35, %v1742_v5 }
  0xec   :  { %v367_v35 = vadd.f32 %v1785_v51, %v1744_v6 }
  0xed   :  { %557 = vmatmul.f32.gmra.mxu2 %v428_v12  ;;  %670 = vmatmul.f32.gmra.mxu3 %v429_v13  ;;  %v438_v13 = vmax.f32 %v248_v4, 0.0 }
  0xf0   :  { %v235_v14 = vpop.f32.mrf.mxu0  ;;  %v348_v17 = vpop.f32.mrf.mxu1 }
  0xf1   :  { %v236_v20 = vadd.f32 %v235_v14, %v1742_v5  ;;  %v349_v21 = vadd.f32 %v348_v17, %v1744_v6  ;;  %v1851_v3 = vpop.f32.mrf.mxu3  ;;  %v1853_v24 = vpop.f32.mrf.mxu2  ;;  %v439_v14 = vmax.f32 %v361_v19, 0.0 }
  0xf3   :  { %v430_v22 = vmax.f32 %v236_v20, 0.0  ;;  %v431_v23 = vmax.f32 %v349_v21, 0.0  ;;  %v1017_v21 = vld [vmem:[%s2250_s7 + $0x18] sm:$0xff] }
  0xf4   :  { %1136 = vmatpush.msrb.mxu1 %v1017_v21 }
  0xf5   :  { %560 = vmatmul.f32.gmra.mxu2 %v430_v22  ;;  %673 = vmatmul.f32.gmra.mxu3 %v431_v23 }
  0xf8   :  { %v238_v30 = vpop.f32.mrf.mxu0  ;;  %v351_v31 = vpop.f32.mrf.mxu1 }
  0xf9   :  { %v239_v32 = vadd.f32 %v238_v30, %v1742_v5  ;;  %v352_v33 = vadd.f32 %v351_v31, %v1744_v6  ;;  %v1860_v36 = vpop.f32.mrf.mxu3  ;;  %v1862_v41 = vpop.f32.mrf.mxu2  ;;  %v440_v30 = vmax.f32 %v251_v27, 0.0  ;;  %v441_v31 = vmax.f32 %v364_v34, 0.0 }
  0xfa   :  { %v449_v27 = vmax.f32 %v376_v60, 0.0 }
  0xfb   :  { %v432_v39 = vmax.f32 %v239_v32, 0.0  ;;  %v433_v40 = vmax.f32 %v352_v33, 0.0 }
  0xfd   :  { %563 = vmatmul.f32.gmra.mxu2 %v432_v39  ;;  %676 = vmatmul.f32.gmra.mxu3 %v433_v40  ;;  %v254_v39 = vadd.f32 %v1778_v43, %v1742_v5  ;;  %v370_v43 = vadd.f32 %v1791_v59, %v1744_v6  ;;  %v373_v59 = vadd.f32 %v1800_v7, %v1744_v6 }
 0x100   :  { %v241_v45 = vpop.f32.mrf.mxu0 }
 0x101   :  { %v242_v46 = vadd.f32 %v241_v45, %v1742_v5  ;;  %v1867_v47 = vpop.f32.mrf.mxu3  ;;  %v442_v45 = vmax.f32 %v254_v39, 0.0 }
 0x103   :  { %v434_v53 = vmax.f32 %v242_v46, 0.0  ;;  %v443_v46 = vmax.f32 %v367_v35, 0.0  ;;  %v1015_v35 = vld [vmem:[%s2250_s7 + $0x8] sm:$0xff] }
 0x105   :  { %566 = vmatmul.f32.gmra.mxu2 %v434_v53  ;;  %679 = vmatmul.f32.gmra.mxu3 %v435_v50 }
 0x108   :  { %v519_v56 = vpop.f32.mrf.mxu2 }
 0x109   :  { %v520_v57 = vadd.f32 %v1872_v54, %v519_v56  ;;  %v632_v62 = vpop.f32.mrf.mxu3 }
 0x10b   :  { %v633_v1 = vadd.f32 %v632_v62, %v520_v57  ;;  %v444_v57 = vmax.f32 %v257_v55, 0.0  ;;  %v445_v62 = vmax.f32 %v370_v43, 0.0  ;;  %v272_v55 = vadd.f32 %v1823_v38, %v1742_v5 }
 0x10c   :  { %v388_v38 = vadd.f32 %v1836_v58, %v1744_v6  ;;  %v391_v58 = vadd.f32 %v1845_v10, %v1744_v6 }
 0x10d   :  { %v728_v2 = vmax.f32 %v633_v1, 0.0  ;;  %569 = vmatmul.f32.gmra.mxu2 %v436_v63  ;;  %682 = vmatmul.f32.gmra.mxu3 %v437_v0  ;;  %v1016_v1 = vld [vmem:[%s2250_s7 + $0x10] sm:$0xff] }
 0x10e   :  { %1137 = vmatpush.msrb.mxu1 %v1016_v1 }
 0x10f   :  { %1340 = vmatmul.msk.f32.vlgmr.msrb.gmra.mxu0 %vm772_vm3, %v728_v2 }
 0x110   :  { %v522_v26 = vpop.f32.mrf.mxu2  ;;  %1138 = vmatpush.msrb.mxu1 %v1015_v35 }
 0x111   :  { %v523_v9 = vadd.f32 %v1872_v54, %v522_v26  ;;  %v635_v12 = vpop.f32.mrf.mxu3  ;;  %v446_v26 = vmax.f32 %v260_v52, 0.0 }
 0x113   :  { %v636_v17 = vadd.f32 %v635_v12, %v523_v9  ;;  %v447_v9 = vmax.f32 %v373_v59, 0.0  ;;  %v457_v59 = vmax.f32 %v388_v38, 0.0 }
 0x115   :  { %v729_v20 = vmax.f32 %v636_v17, 0.0  ;;  %572 = vmatmul.f32.gmra.mxu2 %v438_v13  ;;  %685 = vmatmul.f32.gmra.mxu3 %v439_v14  ;;  %v263_v14 = vadd.f32 %v1802_v8, %v1742_v5  ;;  %v379_v8 = vadd.f32 %v1815_v25, %v1744_v6  ;;  %v382_v25 = vadd.f32 %v1821_v37, %v1744_v6 }
 0x117   :  { %1341 = vmatmul.msk.f32.gmra.mxu0 %vm772_vm3, %v729_v20  ;;  %v448_v21 = vmax.f32 %v263_v14, 0.0  ;;  %v459_v14 = vmax.f32 %v391_v58, 0.0 }
 0x118   :  { %v525_v22 = vpop.f32.mrf.mxu2 }
 0x119   :  { %v526_v23 = vadd.f32 %v1872_v54, %v525_v22  ;;  %v638_v29 = vpop.f32.mrf.mxu3 }
 0x11b   :  { %v639_v32 = vadd.f32 %v638_v29, %v526_v23  ;;  %v266_v23 = vadd.f32 %v1808_v16, %v1742_v5  ;;  %v269_v16 = vadd.f32 %v1817_v28, %v1742_v5  ;;  %v385_v28 = vadd.f32 %v1830_v48, %v1744_v6 }
 0x11d   :  { %v730_v33 = vmax.f32 %v639_v32, 0.0  ;;  %575 = vmatmul.f32.gmra.mxu2 %v440_v30  ;;  %688 = vmatmul.f32.gmra.mxu3 %v441_v31  ;;  %v450_v31 = vmax.f32 %v266_v23, 0.0  ;;  %v451_v32 = vmax.f32 %v379_v8, 0.0  ;;  %v284_v8 = vadd.f32 %v1853_v24, %v1742_v5 }
 0x11e   :  { %v400_v24 = vadd.f32 %v1867_v47, %v1744_v6 }
 0x11f   :  { %1342 = vmatmul.msk.f32.gmra.mxu0 %vm772_vm3, %v730_v33 }
 0x120   :  { %v528_v42 = vpop.f32.mrf.mxu2 }
 0x121   :  { %v529_v40 = vadd.f32 %v1872_v54, %v528_v42  ;;  %v641_v44 = vpop.f32.mrf.mxu3 }
 0x123   :  { %v642_v50 = vadd.f32 %v641_v44, %v529_v40 }
 0x125   :  { %v731_v53 = vmax.f32 %v642_v50, 0.0  ;;  %578 = vmatmul.f32.gmra.mxu2 %v442_v45  ;;  %691 = vmatmul.f32.gmra.mxu3 %v443_v46  ;;  %v452_v45 = vmax.f32 %v269_v16, 0.0  ;;  %v453_v46 = vmax.f32 %v382_v25, 0.0 }
 0x127   :  { %1343 = vmatmul.msk.f32.gmra.mxu0 %vm772_vm3, %v731_v53 }
 0x128   :  { %v531_v51 = vpop.f32.mrf.mxu2 }
 0x129   :  { %v532_v18 = vadd.f32 %v1872_v54, %v531_v51  ;;  %v644_v56 = vpop.f32.mrf.mxu3 }
 0x12b   :  { %v645_v63 = vadd.f32 %v644_v56, %v532_v18  ;;  %v454_v18 = vmax.f32 %v272_v55, 0.0  ;;  %v455_v56 = vmax.f32 %v385_v28, 0.0  ;;  %v1982_v55 = vld [vmem:[%s2251_s6] ss:$0 sm:$0xff] }
 0x12d   :  { %v732_v0 = vmax.f32 %v645_v63, 0.0  ;;  %581 = vmatmul.f32.gmra.mxu2 %v444_v57  ;;  %694 = vmatmul.f32.gmra.mxu3 %v445_v62  ;;  %v275_v63 = vadd.f32 %v1832_v49, %v1742_v5  ;;  %v278_v49 = vadd.f32 %v1838_v61, %v1742_v5  ;;  %v394_v61 = vadd.f32 %v1851_v3, %v1744_v6 }
 0x12f   :  { %1344 = vmatmul.msk.f32.gmra.mxu0 %vm772_vm3, %v732_v0  ;;  %v456_v52 = vmax.f32 %v275_v63, 0.0 }
 0x130   :  { %v534_v2 = vpop.f32.mrf.mxu2 }
 0x131   :  { %v535_v4 = vadd.f32 %v1872_v54, %v534_v2  ;;  %v647_v19 = vpop.f32.mrf.mxu3 }
 0x133   :  { %v648_v12 = vadd.f32 %v647_v19, %v535_v4  ;;  %v1014_v19 = vld [vmem:[%s2250_s7] sm:$0xff] }
 0x134   :  { %1139 = vmatpush.msrb.mxu1 %v1014_v19 }
 0x135   :  { %v733_v13 = vmax.f32 %v648_v12, 0.0  ;;  %584 = vmatmul.f32.gmra.mxu2 %v446_v26  ;;  %697 = vmatmul.f32.gmra.mxu3 %v447_v9 }
 0x137   :  { %1345 = vmatmul.msk.f32.gmra.mxu0 %vm772_vm3, %v733_v13  ;;  %v458_v13 = vmax.f32 %v278_v49, 0.0 }
 0x138   :  { %v537_v7 = vpop.f32.mrf.mxu2 }
 0x139   :  { %v538_v17 = vadd.f32 %v1872_v54, %v537_v7  ;;  %v650_v20 = vpop.f32.mrf.mxu3 }
 0x13b   :  { %v651_v34 = vadd.f32 %v650_v20, %v538_v17  ;;  %v281_v17 = vadd.f32 %v1847_v11, %v1742_v5  ;;  %v397_v11 = vadd.f32 %v1860_v36, %v1744_v6 }
 0x13d   :  { %v734_v22 = vmax.f32 %v651_v34, 0.0  ;;  %587 = vmatmul.f32.gmra.mxu2 %v448_v21  ;;  %700 = vmatmul.f32.gmra.mxu3 %v449_v27  ;;  %v460_v27 = vmax.f32 %v281_v17, 0.0  ;;  %v461_v34 = vmax.f32 %v394_v61, 0.0 }
 0x13f   :  { %1346 = vmatmul.msk.f32.gmra.mxu0 %vm772_vm3, %v734_v22 }
 0x140   :  { %v540_v15 = vpop.f32.mrf.mxu2 }
 0x141   :  { %v541_v29 = vadd.f32 %v1872_v54, %v540_v15  ;;  %v653_v30 = vpop.f32.mrf.mxu3 }
 0x143   :  { %v654_v33 = vadd.f32 %v653_v30, %v541_v29  ;;  %v462_v30 = vmax.f32 %v284_v8, 0.0 }
 0x145   :  { %v735_v39 = vmax.f32 %v654_v33, 0.0  ;;  %590 = vmatmul.f32.gmra.mxu2 %v450_v31  ;;  %703 = vmatmul.f32.gmra.mxu3 %v451_v32  ;;  %v463_v31 = vmax.f32 %v397_v11, 0.0 }
 0x147   :  { %1347 = vmatmul.msk.f32.gmra.mxu0 %vm772_vm3, %v735_v39  ;;  %v287_v39 = vadd.f32 %v1862_v41, %v1742_v5 }
 0x148   :  { %v543_v42 = vpop.f32.mrf.mxu2 }
 0x149   :  { %v544_v40 = vadd.f32 %v1872_v54, %v543_v42  ;;  %v656_v44 = vpop.f32.mrf.mxu3  ;;  %v464_v25 = vmax.f32 %v287_v39, 0.0  ;;  %v465_v42 = vmax.f32 %v400_v24, 0.0 }
 0x14b   :  { %v657_v50 = vadd.f32 %v656_v44, %v544_v40 }
 0x14d   :  { %v736_v53 = vmax.f32 %v657_v50, 0.0  ;;  %593 = vmatmul.f32.gmra.mxu2 %v452_v45  ;;  %706 = vmatmul.f32.gmra.mxu3 %v453_v46 }
 0x14f   :  { %1348 = vmatmul.msk.f32.gmra.mxu0 %vm772_vm3, %v736_v53 }
 0x150   :  { %v546_v37 = vpop.f32.mrf.mxu2 }
 0x151   :  { %v547_v43 = vadd.f32 %v1872_v54, %v546_v37  ;;  %v659_v51 = vpop.f32.mrf.mxu3 }
 0x153   :  { %v660_v57 = vadd.f32 %v659_v51, %v547_v43 }
 0x155   :  { %v737_v62 = vmax.f32 %v660_v57, 0.0  ;;  %596 = vmatmul.f32.gmra.mxu2 %v454_v18  ;;  %709 = vmatmul.f32.gmra.mxu3 %v455_v56 }
 0x157   :  { %1349 = vmatmul.msk.f32.gmra.mxu0 %vm772_vm3, %v737_v62 }
 0x158   :  { %v549_v48 = vpop.f32.mrf.mxu2 }
 0x159   :  { %v550_v0 = vadd.f32 %v1872_v54, %v549_v48  ;;  %v662_v1 = vpop.f32.mrf.mxu3 }
 0x15b   :  { %v663_v2 = vadd.f32 %v662_v1, %v550_v0 }
 0x15d   :  { %v738_v4 = vmax.f32 %v663_v2, 0.0  ;;  %599 = vmatmul.f32.gmra.mxu2 %v456_v52  ;;  %712 = vmatmul.f32.gmra.mxu3 %v457_v59 }
 0x15f   :  { %1350 = vmatmul.msk.f32.gmra.mxu0 %vm772_vm3, %v738_v4 }
 0x160   :  { %v552_v26 = vpop.f32.mrf.mxu2 }
 0x161   :  { %v553_v9 = vadd.f32 %v1872_v54, %v552_v26  ;;  %v665_v12 = vpop.f32.mrf.mxu3 }
 0x163   :  { %v666_v60 = vadd.f32 %v665_v12, %v553_v9 }
 0x165   :  { %v739_v7 = vmax.f32 %v666_v60, 0.0  ;;  %602 = vmatmul.f32.gmra.mxu2 %v458_v13  ;;  %715 = vmatmul.f32.gmra.mxu3 %v459_v14 }
 0x167   :  { %1351 = vmatmul.msk.f32.gmra.mxu0 %vm772_vm3, %v739_v7 }
 0x168   :  { %v555_v10 = vpop.f32.mrf.mxu2 }
 0x169   :  { %v556_v20 = vadd.f32 %v1872_v54, %v555_v10  ;;  %v668_v21 = vpop.f32.mrf.mxu3 }
 0x16b   :  { %v669_v22 = vadd.f32 %v668_v21, %v556_v20 }
 0x16d   :  { %v740_v23 = vmax.f32 %v669_v22, 0.0  ;;  %605 = vmatmul.f32.gmra.mxu2 %v460_v27  ;;  %718 = vmatmul.f32.gmra.mxu3 %v461_v34 }
 0x16f   :  { %1352 = vmatmul.msk.f32.gmra.mxu0 %vm772_vm3, %v740_v23 }
 0x170   :  { %v558_v3 = vpop.f32.mrf.mxu2 }
 0x171   :  { %v559_v15 = vadd.f32 %v1872_v54, %v558_v3  ;;  %v671_v29 = vpop.f32.mrf.mxu3 }
 0x173   :  { %v672_v32 = vadd.f32 %v671_v29, %v559_v15 }
 0x175   :  { %v741_v33 = vmax.f32 %v672_v32, 0.0  ;;  %608 = vmatmul.f32.gmra.mxu2 %v462_v30  ;;  %721 = vmatmul.f32.gmra.mxu3 %v463_v31 }
 0x177   :  { %1353 = vmatmul.msk.f32.gmra.mxu0 %vm772_vm3, %v741_v33 }
 0x178   :  { %v561_v36 = vpop.f32.mrf.mxu2 }
 0x179   :  { %v562_v35 = vadd.f32 %v1872_v54, %v561_v36  ;;  %v674_v16 = vpop.f32.mrf.mxu3 }
 0x17b   :  { %v675_v40 = vadd.f32 %v674_v16, %v562_v35 }
 0x17d   :  { %v742_v44 = vmax.f32 %v675_v40, 0.0  ;;  %611 = vmatmul.f32.gmra.mxu2 %v464_v25  ;;  %724 = vmatmul.f32.gmra.mxu3 %v465_v42 }
 0x17f   :  { %1354 = vmatmul.msk.f32.gmra.mxu0 %vm772_vm3, %v742_v44 }
 0x180   :  { %v564_v45 = vpop.f32.mrf.mxu2 }
 0x181   :  { %v565_v5 = vadd.f32 %v1872_v54, %v564_v45  ;;  %v677_v41 = vpop.f32.mrf.mxu3 }
 0x183   :  { %v678_v46 = vadd.f32 %v677_v41, %v565_v5 }
 0x185   :  { %v743_v6 = vmax.f32 %v678_v46, 0.0 }
 0x187   :  { %1355 = vmatmul.msk.f32.gmra.mxu0 %vm772_vm3, %v743_v6 }
 0x188   :  { %v567_v47 = vpop.f32.mrf.mxu2 }
 0x189   :  { %v568_v50 = vadd.f32 %v1872_v54, %v567_v47  ;;  %v680_v53 = vpop.f32.mrf.mxu3 }
 0x18b   :  { %v681_v28 = vadd.f32 %v680_v53, %v568_v50 }
 0x18c   :  { %v886_v37 = vpop.f32.mrf.mxu0 }
 0x18d   :  { %v744_v43 = vmax.f32 %v681_v28, 0.0  ;;  %v887_v51 = vadd.f32 %v1982_v55, %v886_v37 }
 0x18f   :  { %v982_v18 = vmax.f32 %v887_v51, 0.0  ;;  %1356 = vmatmul.msk.f32.gmra.mxu0 %vm772_vm3, %v744_v43 }
 0x190   :  { %v570_v56 = vpop.f32.mrf.mxu2 }
 0x191   :  { %v571_v57 = vadd.f32 %v1872_v54, %v570_v56  ;;  %v683_v62 = vpop.f32.mrf.mxu3  ;;  %1373 = vmatmul.msk.f32.vlgmr.msrb.gmra.mxu1 %vm1023_vm4, %v982_v18 }
 0x193   :  { %v684_v63 = vadd.f32 %v683_v62, %v571_v57 }
 0x194   :  { %v889_v38 = vpop.f32.mrf.mxu0 }
 0x195   :  { %v745_v48 = vmax.f32 %v684_v63, 0.0  ;;  %v890_v0 = vadd.f32 %v1982_v55, %v889_v38 }
 0x197   :  { %v983_v1 = vmax.f32 %v890_v0, 0.0  ;;  %1357 = vmatmul.msk.f32.gmra.mxu0 %vm772_vm3, %v745_v48 }
 0x198   :  { %v573_v52 = vpop.f32.mrf.mxu2 }
 0x199   :  { %v574_v59 = vadd.f32 %v1872_v54, %v573_v52  ;;  %v686_v2 = vpop.f32.mrf.mxu3  ;;  %1374 = vmatmul.msk.f32.gmra.mxu1 %vm1023_vm4, %v983_v1 }
 0x19b   :  { %v687_v4 = vadd.f32 %v686_v2, %v574_v59 }
 0x19c   :  { %v892_v19 = vpop.f32.mrf.mxu0 }
 0x19d   :  { %v746_v49 = vmax.f32 %v687_v4, 0.0  ;;  %v893_v58 = vadd.f32 %v1982_v55, %v892_v19 }
 0x19f   :  { %v984_v26 = vmax.f32 %v893_v58, 0.0  ;;  %1358 = vmatmul.msk.f32.gmra.mxu0 %vm772_vm3, %v746_v49 }
 0x1a0   :  { %v576_v9 = vpop.f32.mrf.mxu2 }
 0x1a1   :  { %v577_v12 = vadd.f32 %v1872_v54, %v576_v9  ;;  %v689_v13 = vpop.f32.mrf.mxu3  ;;  %1375 = vmatmul.msk.f32.gmra.mxu1 %vm1023_vm4, %v984_v26 }
 0x1a3   :  { %v690_v14 = vadd.f32 %v689_v13, %v577_v12 }
 0x1a4   :  { %v895_v60 = vpop.f32.mrf.mxu0 }
 0x1a5   :  { %v747_v7 = vmax.f32 %v690_v14, 0.0  ;;  %v896_v17 = vadd.f32 %v1982_v55, %v895_v60 }
 0x1a7   :  { %v985_v61 = vmax.f32 %v896_v17, 0.0  ;;  %1359 = vmatmul.msk.f32.gmra.mxu0 %vm772_vm3, %v747_v7 }
 0x1a8   :  { %v579_v10 = vpop.f32.mrf.mxu2 }
 0x1a9   :  { %v580_v20 = vadd.f32 %v1872_v54, %v579_v10  ;;  %v692_v21 = vpop.f32.mrf.mxu3  ;;  %1376 = vmatmul.msk.f32.gmra.mxu1 %vm1023_vm4, %v985_v61 }
 0x1ab   :  { %v693_v27 = vadd.f32 %v692_v21, %v580_v20 }
 0x1ac   :  { %v898_v34 = vpop.f32.mrf.mxu0 }
 0x1ad   :  { %v748_v22 = vmax.f32 %v693_v27, 0.0  ;;  %v899_v23 = vadd.f32 %v1982_v55, %v898_v34 }
 0x1af   :  { %v986_v8 = vmax.f32 %v899_v23, 0.0  ;;  %1360 = vmatmul.msk.f32.gmra.mxu0 %vm772_vm3, %v748_v22 }
 0x1b0   :  { %v582_v11 = vpop.f32.mrf.mxu2 }
 0x1b1   :  { %v583_v3 = vadd.f32 %v1872_v54, %v582_v11  ;;  %v695_v15 = vpop.f32.mrf.mxu3  ;;  %1377 = vmatmul.msk.f32.gmra.mxu1 %vm1023_vm4, %v986_v8 }
 0x1b3   :  { %v696_v29 = vadd.f32 %v695_v15, %v583_v3 }
 0x1b4   :  { %v901_v30 = vpop.f32.mrf.mxu0 }
 0x1b5   :  { %v749_v31 = vmax.f32 %v696_v29, 0.0  ;;  %v902_v32 = vadd.f32 %v1982_v55, %v901_v30 }
 0x1b7   :  { %v987_v33 = vmax.f32 %v902_v32, 0.0  ;;  %1361 = vmatmul.msk.f32.gmra.mxu0 %vm772_vm3, %v749_v31 }
 0x1b8   :  { %v585_v39 = vpop.f32.mrf.mxu2 }
 0x1b9   :  { %v586_v24 = vadd.f32 %v1872_v54, %v585_v39  ;;  %v698_v36 = vpop.f32.mrf.mxu3  ;;  %1378 = vmatmul.msk.f32.gmra.mxu1 %vm1023_vm4, %v987_v33 }
 0x1bb   :  { %v699_v35 = vadd.f32 %v698_v36, %v586_v24 }
 0x1bc   :  { %v904_v16 = vpop.f32.mrf.mxu0 }
 0x1bd   :  { %v750_v25 = vmax.f32 %v699_v35, 0.0  ;;  %v905_v42 = vadd.f32 %v1982_v55, %v904_v16 }
 0x1bf   :  { %v988_v40 = vmax.f32 %v905_v42, 0.0  ;;  %1362 = vmatmul.msk.f32.gmra.mxu0 %vm772_vm3, %v750_v25 }
 0x1c0   :  { %v588_v44 = vpop.f32.mrf.mxu2 }
 0x1c1   :  { %v589_v45 = vadd.f32 %v1872_v54, %v588_v44  ;;  %v701_v5 = vpop.f32.mrf.mxu3  ;;  %1379 = vmatmul.msk.f32.gmra.mxu1 %vm1023_vm4, %v988_v40 }
 0x1c3   :  { %v702_v41 = vadd.f32 %v701_v5, %v589_v45 }
 0x1c4   :  { %v907_v46 = vpop.f32.mrf.mxu0 }
 0x1c5   :  { %v751_v6 = vmax.f32 %v702_v41, 0.0  ;;  %v908_v47 = vadd.f32 %v1982_v55, %v907_v46 }
 0x1c7   :  { %v989_v50 = vmax.f32 %v908_v47, 0.0  ;;  %1363 = vmatmul.msk.f32.gmra.mxu0 %vm772_vm3, %v751_v6 }
 0x1c8   :  { %v591_v53 = vpop.f32.mrf.mxu2 }
 0x1c9   :  { %v592_v28 = vadd.f32 %v1872_v54, %v591_v53  ;;  %v704_v37 = vpop.f32.mrf.mxu3  ;;  %1380 = vmatmul.msk.f32.gmra.mxu1 %vm1023_vm4, %v989_v50 }
 0x1cb   :  { %v705_v43 = vadd.f32 %v704_v37, %v592_v28  ;;  %v2050_v37 = vld [vmem:[%s2252_s8] ss:$0 sm:$0xff] }
 0x1cc   :  { %v910_v51 = vpop.f32.mrf.mxu0 }
 0x1cd   :  { %v752_v18 = vmax.f32 %v705_v43, 0.0  ;;  %v911_v56 = vadd.f32 %v1982_v55, %v910_v51 }
 0x1cf   :  { %v990_v57 = vmax.f32 %v911_v56, 0.0  ;;  %1364 = vmatmul.msk.f32.gmra.mxu0 %vm772_vm3, %v752_v18 }
 0x1d0   :  { %v594_v62 = vpop.f32.mrf.mxu2 }
 0x1d1   :  { %v595_v63 = vadd.f32 %v1872_v54, %v594_v62  ;;  %v707_v38 = vpop.f32.mrf.mxu3  ;;  %1381 = vmatmul.msk.f32.gmra.mxu1 %vm1023_vm4, %v990_v57 }
 0x1d3   :  { %v708_v48 = vadd.f32 %v707_v38, %v595_v63 }
 0x1d4   :  { %v913_v0 = vpop.f32.mrf.mxu0 }
 0x1d5   :  { %v753_v1 = vmax.f32 %v708_v48, 0.0  ;;  %v914_v52 = vadd.f32 %v1982_v55, %v913_v0 }
 0x1d7   :  { %v991_v59 = vmax.f32 %v914_v52, 0.0  ;;  %1365 = vmatmul.msk.f32.gmra.mxu0 %vm772_vm3, %v753_v1 }
 0x1d8   :  { %v597_v2 = vpop.f32.mrf.mxu2 }
 0x1d9   :  { %v598_v4 = vadd.f32 %v1872_v54, %v597_v2  ;;  %v710_v19 = vpop.f32.mrf.mxu3  ;;  %1382 = vmatmul.msk.f32.gmra.mxu1 %vm1023_vm4, %v991_v59 }
 0x1db   :  { %v711_v49 = vadd.f32 %v710_v19, %v598_v4 }
 0x1dc   :  { %v916_v58 = vpop.f32.mrf.mxu0 }
 0x1dd   :  { %v754_v26 = vmax.f32 %v711_v49, 0.0  ;;  %v917_v9 = vadd.f32 %v1982_v55, %v916_v58 }
 0x1df   :  { %v992_v12 = vmax.f32 %v917_v9, 0.0  ;;  %1366 = vmatmul.msk.f32.gmra.mxu0 %vm772_vm3, %v754_v26 }
 0x1e0   :  { %v600_v13 = vpop.f32.mrf.mxu2 }
 0x1e1   :  { %v601_v14 = vadd.f32 %v1872_v54, %v600_v13  ;;  %v713_v60 = vpop.f32.mrf.mxu3  ;;  %1383 = vmatmul.msk.f32.gmra.mxu1 %vm1023_vm4, %v992_v12 }
 0x1e3   :  { %v714_v7 = vadd.f32 %v713_v60, %v601_v14 }
 0x1e4   :  { %v919_v17 = vpop.f32.mrf.mxu0 }
 0x1e5   :  { %v755_v61 = vmax.f32 %v714_v7, 0.0  ;;  %v920_v10 = vadd.f32 %v1982_v55, %v919_v17 }
 0x1e7   :  { %v993_v20 = vmax.f32 %v920_v10, 0.0  ;;  %1367 = vmatmul.msk.f32.gmra.mxu0 %vm772_vm3, %v755_v61 }
 0x1e8   :  { %v603_v21 = vpop.f32.mrf.mxu2 }
 0x1e9   :  { %v604_v27 = vadd.f32 %v1872_v54, %v603_v21  ;;  %v716_v34 = vpop.f32.mrf.mxu3  ;;  %1384 = vmatmul.msk.f32.gmra.mxu1 %vm1023_vm4, %v993_v20 }
 0x1eb   :  { %v717_v22 = vadd.f32 %v716_v34, %v604_v27 }
 0x1ec   :  { %v922_v23 = vpop.f32.mrf.mxu0 }
 0x1ed   :  { %v756_v8 = vmax.f32 %v717_v22, 0.0  ;;  %v923_v11 = vadd.f32 %v1982_v55, %v922_v23 }
 0x1ef   :  { %v994_v3 = vmax.f32 %v923_v11, 0.0  ;;  %1368 = vmatmul.msk.f32.gmra.mxu0 %vm772_vm3, %v756_v8 }
 0x1f0   :  { %v606_v15 = vpop.f32.mrf.mxu2 }
 0x1f1   :  { %v607_v29 = vadd.f32 %v1872_v54, %v606_v15  ;;  %v719_v30 = vpop.f32.mrf.mxu3  ;;  %1385 = vmatmul.msk.f32.gmra.mxu1 %vm1023_vm4, %v994_v3 }
 0x1f3   :  { %v720_v31 = vadd.f32 %v719_v30, %v607_v29 }
 0x1f4   :  { %v925_v32 = vpop.f32.mrf.mxu0 }
 0x1f5   :  { %v757_v33 = vmax.f32 %v720_v31, 0.0  ;;  %v926_v39 = vadd.f32 %v1982_v55, %v925_v32 }
 0x1f7   :  { %v995_v24 = vmax.f32 %v926_v39, 0.0  ;;  %1369 = vmatmul.msk.f32.gmra.mxu0 %vm772_vm3, %v757_v33 }
 0x1f8   :  { %v609_v36 = vpop.f32.mrf.mxu2 }
 0x1f9   :  { %v610_v35 = vadd.f32 %v1872_v54, %v609_v36  ;;  %v722_v16 = vpop.f32.mrf.mxu3  ;;  %1386 = vmatmul.msk.f32.gmra.mxu1 %vm1023_vm4, %v995_v24 }
 0x1fb   :  { %v723_v25 = vadd.f32 %v722_v16, %v610_v35 }
 0x1fc   :  { %v928_v42 = vpop.f32.mrf.mxu0 }
 0x1fd   :  { %v758_v40 = vmax.f32 %v723_v25, 0.0  ;;  %v929_v44 = vadd.f32 %v1982_v55, %v928_v42 }
 0x1ff   :  { %v996_v45 = vmax.f32 %v929_v44, 0.0  ;;  %1370 = vmatmul.msk.f32.gmra.mxu0 %vm772_vm3, %v758_v40 }
 0x200   :  { %v612_v5 = vpop.f32.mrf.mxu2 }
 0x201   :  { %v613_v41 = vadd.f32 %v1872_v54, %v612_v5  ;;  %1387 = vmatmul.msk.f32.gmra.mxu1 %vm1023_vm4, %v996_v45  ;;  %v725_v46 = vpop.f32.mrf.mxu3 }
 0x203   :  { %v726_v6 = vadd.f32 %v725_v46, %v613_v41 }
 0x204   :  { %v931_v47 = vpop.f32.mrf.mxu0 }
 0x205   :  { %v759_v50 = vmax.f32 %v726_v6, 0.0  ;;  %v932_v53 = vadd.f32 %v1982_v55, %v931_v47 }
 0x207   :  { %v997_v28 = vmax.f32 %v932_v53, 0.0  ;;  %1371 = vmatmul.msk.f32.vlgmr.msra.gmra.mxu2 %vm772_vm3, %v759_v50 }
 0x209   :  { %1388 = vmatmul.msk.f32.gmra.mxu1 %vm1023_vm4, %v997_v28 }
 0x20c   :  { %v934_v43 = vpop.f32.mrf.mxu0 }
 0x20d   :  { %v935_v54 = vadd.f32 %v1982_v55, %v934_v43 }
 0x20e   :  { %v1141_v51 = vpop.f32.mrf.mxu1 }
 0x20f   :  { %v998_v18 = vmax.f32 %v935_v54, 0.0  ;;  %v1142_v56 = vadd.f32 %v2050_v37, %v1141_v51 }
 0x211   :  { %1238 = vst.msk [vmem:[%s2253_s9] sm:$0xff] %vm1237_vm5, %v1142_v56  ;;  %1389 = vmatmul.msk.f32.gmra.mxu1 %vm1023_vm4, %v998_v18 }
 0x214   :  { %v937_v57 = vpop.f32.mrf.mxu0 }
 0x215   :  { %v938_v62 = vadd.f32 %v1982_v55, %v937_v57 }
 0x216   :  { %v1144_v63 = vpop.f32.mrf.mxu1 }
 0x217   :  { %v999_v38 = vmax.f32 %v938_v62, 0.0  ;;  %v1145_v48 = vadd.f32 %v2050_v37, %v1144_v63 }
 0x219   :  { %1239 = vst.msk [vmem:[%s2253_s9 + $0x8] sm:$0xff] %vm1237_vm5, %v1145_v48  ;;  %1390 = vmatmul.msk.f32.gmra.mxu1 %vm1023_vm4, %v999_v38 }
 0x21c   :  { %v940_v0 = vpop.f32.mrf.mxu0 }
 0x21d   :  { %v941_v1 = vadd.f32 %v1982_v55, %v940_v0 }
 0x21e   :  { %v1147_v52 = vpop.f32.mrf.mxu1 }
 0x21f   :  { %v1000_v59 = vmax.f32 %v941_v1, 0.0  ;;  %v1148_v2 = vadd.f32 %v2050_v37, %v1147_v52 }
 0x221   :  { %1240 = vst.msk [vmem:[%s2253_s9 + $0x10] sm:$0xff] %vm1237_vm5, %v1148_v2  ;;  %1391 = vmatmul.msk.f32.gmra.mxu1 %vm1023_vm4, %v1000_v59 }
 0x224   :  { %v943_v4 = vpop.f32.mrf.mxu0 }
 0x225   :  { %v944_v19 = vadd.f32 %v1982_v55, %v943_v4 }
 0x226   :  { %v1150_v49 = vpop.f32.mrf.mxu1 }
 0x227   :  { %v1001_v58 = vmax.f32 %v944_v19, 0.0  ;;  %v1151_v26 = vadd.f32 %v2050_v37, %v1150_v49 }
 0x229   :  { %1241 = vst.msk [vmem:[%s2253_s9 + $0x18] sm:$0xff] %vm1237_vm5, %v1151_v26  ;;  %1392 = vmatmul.msk.f32.gmra.mxu1 %vm1023_vm4, %v1001_v58 }
 0x22c   :  { %v946_v9 = vpop.f32.mrf.mxu0 }
 0x22d   :  { %v947_v12 = vadd.f32 %v1982_v55, %v946_v9 }
 0x22e   :  { %v1153_v13 = vpop.f32.mrf.mxu1 }
 0x22f   :  { %v1002_v14 = vmax.f32 %v947_v12, 0.0  ;;  %v1154_v60 = vadd.f32 %v2050_v37, %v1153_v13 }
 0x231   :  { %1242 = vst.msk [vmem:[%s2253_s9 + $0x20] sm:$0xff] %vm1237_vm5, %v1154_v60  ;;  %1393 = vmatmul.msk.f32.gmra.mxu1 %vm1023_vm4, %v1002_v14 }
 0x234   :  { %v949_v7 = vpop.f32.mrf.mxu0 }
 0x235   :  { %v950_v17 = vadd.f32 %v1982_v55, %v949_v7 }
 0x236   :  { %v1156_v61 = vpop.f32.mrf.mxu1 }
 0x237   :  { %v1003_v10 = vmax.f32 %v950_v17, 0.0  ;;  %v1157_v20 = vadd.f32 %v2050_v37, %v1156_v61 }
 0x239   :  { %1243 = vst.msk [vmem:[%s2253_s9 + $0x28] sm:$0xff] %vm1237_vm5, %v1157_v20  ;;  %1394 = vmatmul.msk.f32.gmra.mxu1 %vm1023_vm4, %v1003_v10 }
 0x23c   :  { %v952_v21 = vpop.f32.mrf.mxu0 }
 0x23d   :  { %v953_v27 = vadd.f32 %v1982_v55, %v952_v21 }
 0x23e   :  { %v1159_v34 = vpop.f32.mrf.mxu1 }
 0x23f   :  { %v1004_v22 = vmax.f32 %v953_v27, 0.0  ;;  %v1160_v23 = vadd.f32 %v2050_v37, %v1159_v34 }
 0x241   :  { %1244 = vst.msk [vmem:[%s2253_s9 + $0x30] sm:$0xff] %vm1237_vm5, %v1160_v23  ;;  %1395 = vmatmul.msk.f32.gmra.mxu1 %vm1023_vm4, %v1004_v22 }
 0x244   :  { %v955_v8 = vpop.f32.mrf.mxu0 }
 0x245   :  { %v956_v11 = vadd.f32 %v1982_v55, %v955_v8 }
 0x246   :  { %v1162_v3 = vpop.f32.mrf.mxu1 }
 0x247   :  { %v1005_v15 = vmax.f32 %v956_v11, 0.0  ;;  %v1163_v29 = vadd.f32 %v2050_v37, %v1162_v3 }
 0x249   :  { %1245 = vst.msk [vmem:[%s2253_s9 + $0x38] sm:$0xff] %vm1237_vm5, %v1163_v29  ;;  %1396 = vmatmul.msk.f32.gmra.mxu1 %vm1023_vm4, %v1005_v15 }
 0x24c   :  { %v958_v30 = vpop.f32.mrf.mxu0 }
 0x24d   :  { %v959_v31 = vadd.f32 %v1982_v55, %v958_v30 }
 0x24e   :  { %v1165_v32 = vpop.f32.mrf.mxu1 }
 0x24f   :  { %v1006_v33 = vmax.f32 %v959_v31, 0.0  ;;  %v1166_v39 = vadd.f32 %v2050_v37, %v1165_v32 }
 0x251   :  { %1246 = vst.msk [vmem:[%s2253_s9 + $0x40] sm:$0xff] %vm1237_vm5, %v1166_v39  ;;  %1397 = vmatmul.msk.f32.gmra.mxu1 %vm1023_vm4, %v1006_v33 }
 0x254   :  { %v961_v24 = vpop.f32.mrf.mxu0 }
 0x255   :  { %v962_v36 = vadd.f32 %v1982_v55, %v961_v24 }
 0x256   :  { %v1168_v35 = vpop.f32.mrf.mxu1 }
 0x257   :  { %v1007_v16 = vmax.f32 %v962_v36, 0.0  ;;  %v1169_v25 = vadd.f32 %v2050_v37, %v1168_v35 }
 0x259   :  { %1247 = vst.msk [vmem:[%s2253_s9 + $0x48] sm:$0xff] %vm1237_vm5, %v1169_v25  ;;  %1398 = vmatmul.msk.f32.gmra.mxu1 %vm1023_vm4, %v1007_v16 }
 0x25c   :  { %v964_v42 = vpop.f32.mrf.mxu0 }
 0x25d   :  { %v965_v40 = vadd.f32 %v1982_v55, %v964_v42 }
 0x25e   :  { %v1171_v44 = vpop.f32.mrf.mxu1 }
 0x25f   :  { %v1008_v45 = vmax.f32 %v965_v40, 0.0  ;;  %v1172_v5 = vadd.f32 %v2050_v37, %v1171_v44 }
 0x261   :  { %1248 = vst.msk [vmem:[%s2253_s9 + $0x50] sm:$0xff] %vm1237_vm5, %v1172_v5  ;;  %1399 = vmatmul.msk.f32.gmra.mxu1 %vm1023_vm4, %v1008_v45 }
 0x264   :  { %v967_v41 = vpop.f32.mrf.mxu0 }
 0x265   :  { %v968_v46 = vadd.f32 %v1982_v55, %v967_v41 }
 0x266   :  { %v1174_v6 = vpop.f32.mrf.mxu1 }
 0x267   :  { %v1009_v47 = vmax.f32 %v968_v46, 0.0  ;;  %v1175_v50 = vadd.f32 %v2050_v37, %v1174_v6 }
 0x269   :  { %1249 = vst.msk [vmem:[%s2253_s9 + $0x58] sm:$0xff] %vm1237_vm5, %v1175_v50  ;;  %1400 = vmatmul.msk.f32.gmra.mxu1 %vm1023_vm4, %v1009_v47 }
 0x26c   :  { %v970_v53 = vpop.f32.mrf.mxu0 }
 0x26d   :  { %v971_v28 = vadd.f32 %v1982_v55, %v970_v53 }
 0x26e   :  { %v1177_v43 = vpop.f32.mrf.mxu1 }
 0x26f   :  { %v1010_v54 = vmax.f32 %v971_v28, 0.0  ;;  %v1178_v51 = vadd.f32 %v2050_v37, %v1177_v43 }
 0x271   :  { %1250 = vst.msk [vmem:[%s2253_s9 + $0x60] sm:$0xff] %vm1237_vm5, %v1178_v51  ;;  %1401 = vmatmul.msk.f32.gmra.mxu1 %vm1023_vm4, %v1010_v54 }
 0x274   :  { %v973_v18 = vpop.f32.mrf.mxu0 }
 0x275   :  { %v974_v56 = vadd.f32 %v1982_v55, %v973_v18 }
 0x276   :  { %v1180_v57 = vpop.f32.mrf.mxu1 }
 0x277   :  { %v1011_v62 = vmax.f32 %v974_v56, 0.0  ;;  %v1181_v63 = vadd.f32 %v2050_v37, %v1180_v57 }
 0x279   :  { %1251 = vst.msk [vmem:[%s2253_s9 + $0x68] sm:$0xff] %vm1237_vm5, %v1181_v63  ;;  %1402 = vmatmul.msk.f32.gmra.mxu1 %vm1023_vm4, %v1011_v62 }
 0x27c   :  { %v976_v38 = vpop.f32.mrf.mxu0 }
 0x27d   :  { %v977_v48 = vadd.f32 %v1982_v55, %v976_v38 }
 0x27e   :  { %v1183_v0 = vpop.f32.mrf.mxu1 }
 0x27f   :  { %v1012_v1 = vmax.f32 %v977_v48, 0.0  ;;  %v1184_v52 = vadd.f32 %v2050_v37, %v1183_v0 }
 0x281   :  { %1252 = vst.msk [vmem:[%s2253_s9 + $0x70] sm:$0xff] %vm1237_vm5, %v1184_v52  ;;  %1403 = vmatmul.msk.f32.gmra.mxu1 %vm1023_vm4, %v1012_v1 }
 0x286   :  { %v1186_v59 = vpop.f32.mrf.mxu1 }
 0x287   :  { %v1187_v2 = vadd.f32 %v2050_v37, %v1186_v59 }
 0x289   :  { %1253 = vst.msk [vmem:[%s2253_s9 + $0x78] sm:$0xff] %vm1237_vm5, %v1187_v2 }
 0x28a   :  { %v979_v4 = vpop.f32.mrf.mxu2 }
 0x28b   :  { %v980_v19 = vadd.f32 %v1982_v55, %v979_v4 }
 0x28d   :  { %v1013_v49 = vmax.f32 %v980_v19, 0.0 }
 0x28e   :  { %v1189_v58 = vpop.f32.mrf.mxu1 }
 0x28f   :  { %v1190_v26 = vadd.f32 %v2050_v37, %v1189_v58  ;;  %1404 = vmatmul.msk.f32.gmra.mxu1 %vm1023_vm4, %v1013_v49 }
 0x291   :  { %1254 = vst.msk [vmem:[%s2253_s9 + $0x80] sm:$0xff] %vm1237_vm5, %v1190_v26 }
 0x296   :  { %v1192_v9 = vpop.f32.mrf.mxu1 }
 0x297   :  { %v1193_v12 = vadd.f32 %v2050_v37, %v1192_v9 }
 0x299   :  { %1255 = vst.msk [vmem:[%s2253_s9 + $0x88] sm:$0xff] %vm1237_vm5, %v1193_v12 }
 0x29e   :  { %v1195_v55 = vpop.f32.mrf.mxu1 }
 0x29f   :  { %v1196_v13 = vadd.f32 %v2050_v37, %v1195_v55 }
 0x2a1   :  { %1256 = vst.msk [vmem:[%s2253_s9 + $0x90] sm:$0xff] %vm1237_vm5, %v1196_v13 }
 0x2a6   :  { %v1198_v14 = vpop.f32.mrf.mxu1 }
 0x2a7   :  { %v1199_v60 = vadd.f32 %v2050_v37, %v1198_v14 }
 0x2a9   :  { %1257 = vst.msk [vmem:[%s2253_s9 + $0x98] sm:$0xff] %vm1237_vm5, %v1199_v60 }
 0x2ae   :  { %v1201_v7 = vpop.f32.mrf.mxu1 }
 0x2af   :  { %v1202_v17 = vadd.f32 %v2050_v37, %v1201_v7 }
 0x2b1   :  { %1258 = vst.msk [vmem:[%s2253_s9 + $0xa0] sm:$0xff] %vm1237_vm5, %v1202_v17 }
 0x2b6   :  { %v1204_v61 = vpop.f32.mrf.mxu1 }
 0x2b7   :  { %v1205_v10 = vadd.f32 %v2050_v37, %v1204_v61 }
 0x2b9   :  { %1259 = vst.msk [vmem:[%s2253_s9 + $0xa8] sm:$0xff] %vm1237_vm5, %v1205_v10 }
 0x2be   :  { %v1207_v20 = vpop.f32.mrf.mxu1 }
 0x2bf   :  { %v1208_v21 = vadd.f32 %v2050_v37, %v1207_v20 }
 0x2c1   :  { %1260 = vst.msk [vmem:[%s2253_s9 + $0xb0] sm:$0xff] %vm1237_vm5, %v1208_v21 }
 0x2c6   :  { %v1210_v27 = vpop.f32.mrf.mxu1 }
 0x2c7   :  { %v1211_v34 = vadd.f32 %v2050_v37, %v1210_v27 }
 0x2c9   :  { %1261 = vst.msk [vmem:[%s2253_s9 + $0xb8] sm:$0xff] %vm1237_vm5, %v1211_v34 }
 0x2ce   :  { %v1213_v22 = vpop.f32.mrf.mxu1 }
 0x2cf   :  { %v1214_v23 = vadd.f32 %v2050_v37, %v1213_v22 }
 0x2d1   :  { %1262 = vst.msk [vmem:[%s2253_s9 + $0xc0] sm:$0xff] %vm1237_vm5, %v1214_v23 }
 0x2d6   :  { %v1216_v8 = vpop.f32.mrf.mxu1 }
 0x2d7   :  { %v1217_v11 = vadd.f32 %v2050_v37, %v1216_v8 }
 0x2d9   :  { %1263 = vst.msk [vmem:[%s2253_s9 + $0xc8] sm:$0xff] %vm1237_vm5, %v1217_v11 }
 0x2de   :  { %v1219_v3 = vpop.f32.mrf.mxu1 }
 0x2df   :  { %v1220_v15 = vadd.f32 %v2050_v37, %v1219_v3 }
 0x2e1   :  { %1264 = vst.msk [vmem:[%s2253_s9 + $0xd0] sm:$0xff] %vm1237_vm5, %v1220_v15 }
 0x2e6   :  { %v1222_v29 = vpop.f32.mrf.mxu1 }
 0x2e7   :  { %v1223_v30 = vadd.f32 %v2050_v37, %v1222_v29 }
 0x2e9   :  { %1265 = vst.msk [vmem:[%s2253_s9 + $0xd8] sm:$0xff] %vm1237_vm5, %v1223_v30 }
 0x2ee   :  { %v1225_v31 = vpop.f32.mrf.mxu1 }
 0x2ef   :  { %v1226_v32 = vadd.f32 %v2050_v37, %v1225_v31 }
 0x2f1   :  { %1266 = vst.msk [vmem:[%s2253_s9 + $0xe0] sm:$0xff] %vm1237_vm5, %v1226_v32 }
 0x2f6   :  { %v1228_v33 = vpop.f32.mrf.mxu1 }
 0x2f7   :  { %v1229_v39 = vadd.f32 %v2050_v37, %v1228_v33 }
 0x2f9   :  { %1267 = vst.msk [vmem:[%s2253_s9 + $0xe8] sm:$0xff] %vm1237_vm5, %v1229_v39 }
 0x2fe   :  { %v1231_v24 = vpop.f32.mrf.mxu1 }
 0x2ff   :  { %v1232_v36 = vadd.f32 %v2050_v37, %v1231_v24 }
 0x301   :  { %1268 = vst.msk [vmem:[%s2253_s9 + $0xf0] sm:$0xff] %vm1237_vm5, %v1232_v36 }
 0x30c   :  { %v1234_v35 = vpop.f32.mrf.mxu1 }
 0x30d   :  { %v1235_v16 = vadd.f32 %v2050_v37, %v1234_v35 }
 0x30f   :  { %1269 = vst.msk [vmem:[%s2253_s9 + $0xf8] sm:$0xff] %vm1237_vm5, %v1235_v16 }

</bundles_post_ra>
